<compile_context>
chip_gen: v5e
topology: v5e:2x2
jax: 0.10.0
libtpu: 0.0.40
codegen_flags: <defaults>
</compile_context>

<pallas_src>
import functools
import math

import jax
import jax.numpy as jnp
import numpy as np
from jax.experimental import pallas as pl
from jax.experimental.pallas import tpu as pltpu

PAD = 0


def _layer_norm(x, g, b, eps=1e-5):
    mu = jnp.mean(x, axis=-1, keepdims=True)
    var = jnp.mean((x - mu) ** 2, axis=-1, keepdims=True)
    return (x - mu) * jax.lax.rsqrt(var + eps) * g + b


def _shift_rows(x, s, T):
    """result[t] = x[t - s] if 0 <= t - s < T else 0.  s is a static int, |s| < T."""
    if s == 0:
        return x
    rolled = pltpu.roll(x, shift=s % T, axis=0)      # static XLU sublane rotate
    row = jax.lax.broadcasted_iota(jnp.int32, (T, 1), 0)
    valid = (row >= s) if s > 0 else (row < T + s)
    return jnp.where(valid, rolled, 0.0)


# ---------------------------------------------------------------------------
# Pallas kernel: one FFT-block layer for one batch row per grid step.
# Grid = (B, L); the residual stream lives in out_ref's VMEM block across L.
# ---------------------------------------------------------------------------
def decoder_stack_kernel(x_ref, mask_ref,
                         wq_ref, bq_ref, wk_ref, bk_ref, wv_ref, bv_ref,
                         wo_ref, bo_ref, ln1_g_ref, ln1_b_ref,
                         w1_ref, b1_ref, w2_ref, b2_ref,
                         ln2_g_ref, ln2_b_ref,
                         out_ref, *, n_head, k1, k2):
    f32 = jnp.float32
    bf16 = jnp.bfloat16

    # Layer 0 seeds the residual stream (x + pos_emb, computed on host).
    @pl.when(pl.program_id(1) == 0)
    def _():
        out_ref[...] = x_ref[...]

    x = out_ref[0].astype(f32)                     # (T, D)
    mask = mask_ref[0].astype(f32)                 # (T, 1)
    T, D = x.shape
    dk = D // n_head
    scale = 1.0 / math.sqrt(dk)
    x_bf = x.astype(bf16)

    # ---------------- multi-head self-attention ----------------
    # Per-head weights are pre-split on the host; context is accumulated
    # directly through W_o per head (no concat along the lane axis).
    attn = jnp.zeros((T, D), f32) + bo_ref[0]
    for hi in range(n_head):                       # static unroll over heads
        qh = jnp.dot(x_bf, wq_ref[0, hi], preferred_element_type=f32) + bq_ref[0, hi]
        kh = jnp.dot(x_bf, wk_ref[0, hi], preferred_element_type=f32) + bk_ref[0, hi]
        vh = jnp.dot(x_bf, wv_ref[0, hi], preferred_element_type=f32) + bv_ref[0, hi]
        # q @ k^T via dot_general (contract last dims; no explicit transpose).
        s = jax.lax.dot_general(qh.astype(bf16), kh.astype(bf16),
                                (((1,), (1,)), ((), ())),
                                preferred_element_type=f32) * scale
        s = s - jnp.max(s, axis=-1, keepdims=True)
        p = jnp.exp(s)
        p = p * pl.reciprocal(jnp.sum(p, axis=-1, keepdims=True), approx=True)
        ctx = jnp.dot(p.astype(bf16), vh.astype(bf16), preferred_element_type=f32)
        attn = attn + jnp.dot(ctx.astype(bf16), wo_ref[0, hi],
                              preferred_element_type=f32)
    # TODO(synk): for long sequences (T >~ 1-2k) KV-tile this with an online
    # softmax so the (T, T) scores never materialize (v7x has only 64 MiB VMEM).
    h = _layer_norm(attn + x, ln1_g_ref[0], ln1_b_ref[0]) * mask

    # ---------------- position-wise conv feed-forward ----------------
    d_inner = w1_ref.shape[-1]

    pad1 = (k1 - 1) // 2
    y = jnp.zeros((T, d_inner), f32) + b1_ref[0]
    for t in range(k1):                            # static unroll over conv taps
        xt = _shift_rows(h, pad1 - t, T)           # zeros outside [0, T)
        y = y + jnp.dot(xt.astype(bf16), w1_ref[0, t], preferred_element_type=f32)
    y = jnp.maximum(y, 0.0)

    pad2 = (k2 - 1) // 2
    z = jnp.zeros((T, D), f32) + b2_ref[0]
    for t in range(k2):
        yt = _shift_rows(y, pad2 - t, T)
        z = z + jnp.dot(yt.astype(bf16), w2_ref[0, t], preferred_element_type=f32)

    out = _layer_norm(z + h, ln2_g_ref[0], ln2_b_ref[0]) * mask
    out_ref[0] = out.astype(out_ref.dtype)


def decoder_stack_pallas(x, mask3, sp, *, n_head, k1, k2):
    B, T, D = x.shape
    L = sp['wq'].shape[0]
    args = [x, mask3,
            sp['wq'], sp['bq'], sp['wk'], sp['bk'], sp['wv'], sp['bv'],
            sp['wo'], sp['bo'], sp['ln1_g'], sp['ln1_b'],
            sp['w1'], sp['b1'], sp['w2'], sp['b2'],
            sp['ln2_g'], sp['ln2_b']]

    def per_layer_spec(a):
        nd = a.ndim
        return pl.BlockSpec((1,) + a.shape[1:],
                            lambda b, l, _nd=nd: (l,) + (0,) * (_nd - 1))

    in_specs = ([pl.BlockSpec((1, T, D), lambda b, l: (b, 0, 0)),
                 pl.BlockSpec((1, T, 1), lambda b, l: (b, 0, 0))]
                + [per_layer_spec(a) for a in args[2:]])
    out_specs = pl.BlockSpec((1, T, D), lambda b, l: (b, 0, 0))

    kern = functools.partial(decoder_stack_kernel, n_head=n_head, k1=k1, k2=k2)
    return pl.pallas_call(
        kern,
        out_shape=jax.ShapeDtypeStruct((B, T, D), jnp.float32),
        grid=(B, L),
        in_specs=in_specs,
        out_specs=out_specs,
        compiler_params=pltpu.CompilerParams(
            dimension_semantics=("parallel", "arbitrary")),
    )(*args)


# ---------------------------------------------------------------------------
# Host-side weight preparation: stack layers, split heads, cast matmul
# weights to bf16 (biases / LN params stay f32).
# ---------------------------------------------------------------------------
def stack_layer_params(layers, n_head):
    L = len(layers)
    bf16 = jnp.bfloat16

    def st(name):
        return jnp.stack([lp[name] for lp in layers], axis=0)

    D = layers[0]['wq'].shape[0]
    dk = D // n_head

    def split_cols(w):          # (L, D, D) -> (L, n_head, D, dk)
        return w.reshape(L, D, n_head, dk).transpose(0, 2, 1, 3)

    def split_bias(b):          # (L, 1, D) -> (L, n_head, 1, dk)
        return b.reshape(L, 1, n_head, dk).transpose(0, 2, 1, 3)

    def split_rows(w):          # (L, D, D) -> (L, n_head, dk, D)
        return w.reshape(L, n_head, dk, D)

    return dict(
        wq=split_cols(st('wq')).astype(bf16), bq=split_bias(st('bq')),
        wk=split_cols(st('wk')).astype(bf16), bk=split_bias(st('bk')),
        wv=split_cols(st('wv')).astype(bf16), bv=split_bias(st('bv')),
        wo=split_rows(st('wo')).astype(bf16), bo=st('bo'),
        ln1_g=st('ln1_g'), ln1_b=st('ln1_b'),
        w1=st('w1').astype(bf16), b1=st('b1'),
        w2=st('w2').astype(bf16), b2=st('b2'),
        ln2_g=st('ln2_g'), ln2_b=st('ln2_b'),
    )


# ---------------------------------------------------------------------------
# Decoder forward (glue in plain JAX: pad mask + position embedding lookup).
# ---------------------------------------------------------------------------
def decoder_forward(enc_seq, enc_pos, position_enc, stacked, *, n_head, kernels):
    non_pad_mask = (enc_pos != PAD).astype(jnp.float32)            # (B, T)
    pos_emb = jnp.take(position_enc, enc_pos, axis=0)              # (B, T, D)
    x = (enc_seq + pos_emb).astype(jnp.float32)
    mask3 = non_pad_mask[:, :, None]                               # (B, T, 1)
    return decoder_stack_pallas(x, mask3, stacked, n_head=n_head,
                                k1=kernels[0], k2=kernels[1])


# ---------------------------------------------------------------------------
# Pure-JAX f32 reference (for correctness check of the Pallas path).
# ---------------------------------------------------------------------------
def fft_block_ref(x, mask3, p, *, n_head, k1, k2):
    B, T, D = x.shape
    dk = D // n_head
    scale = 1.0 / math.sqrt(dk)
    q = x @ p['wq'] + p['bq']
    k = x @ p['wk'] + p['bk']
    v = x @ p['wv'] + p['bv']
    qh = q.reshape(B, T, n_head, dk).transpose(0, 2, 1, 3)
    kh = k.reshape(B, T, n_head, dk).transpose(0, 2, 1, 3)
    vh = v.reshape(B, T, n_head, dk).transpose(0, 2, 1, 3)
    s = jnp.einsum('bhtd,bhsd->bhts', qh, kh) * scale
    a = jax.nn.softmax(s, axis=-1)
    ctx = jnp.einsum('bhts,bhsd->bhtd', a, vh).transpose(0, 2, 1, 3).reshape(B, T, D)
    h = _layer_norm(ctx @ p['wo'] + p['bo'] + x, p['ln1_g'], p['ln1_b']) * mask3

    def conv1d(u, w, b, kk):
        pad = (kk - 1) // 2
        up = jnp.pad(u, ((0, 0), (pad, pad), (0, 0)))
        out = jnp.zeros((B, T, w.shape[2]), jnp.float32) + b
        for t in range(kk):
            out = out + up[:, t:t + T, :] @ w[t]
        return out

    y = jax.nn.relu(conv1d(h, p['w1'], p['b1'], k1))
    z = conv1d(y, p['w2'], p['b2'], k2)
    return _layer_norm(z + h, p['ln2_g'], p['ln2_b']) * mask3


def decoder_forward_ref(enc_seq, enc_pos, params, *, n_head, kernels):
    non_pad_mask = (enc_pos != PAD).astype(jnp.float32)
    pos_emb = jnp.take(params['position_enc'], enc_pos, axis=0)
    x = enc_seq + pos_emb
    mask3 = non_pad_mask[:, :, None]
    for lp in params['layers']:
        x = fft_block_ref(x, mask3, lp, n_head=n_head,
                          k1=kernels[0], k2=kernels[1])
    return x


# ---------------------------------------------------------------------------
# Deterministic parameter init (synthetic; no checkpoint load).
# ---------------------------------------------------------------------------
def init_params(key, *, n_position, d_model, d_inner, n_layers, kernels):
    keys = iter(jax.random.split(key, 4 + n_layers * 16))

    def nrm(shape, scl=0.05):
        return (scl * jax.random.normal(next(keys), shape)).astype(jnp.float32)

    pos_enc = nrm((n_position, d_model), 0.5)
    pos_enc = pos_enc.at[PAD].set(0.0)     # padding_idx=PAD row is zero

    layers = []
    for _ in range(n_layers):
        lp = dict(
            wq=nrm((d_model, d_model)), bq=nrm((1, d_model), 0.01),
            wk=nrm((d_model, d_model)), bk=nrm((1, d_model), 0.01),
            wv=nrm((d_model, d_model)), bv=nrm((1, d_model), 0.01),
            wo=nrm((d_model, d_model)), bo=nrm((1, d_model), 0.01),
            ln1_g=1.0 + nrm((1, d_model), 0.01), ln1_b=nrm((1, d_model), 0.01),
            w1=nrm((kernels[0], d_model, d_inner)), b1=nrm((1, d_inner), 0.01),
            w2=nrm((kernels[1], d_inner, d_model)), b2=nrm((1, d_model), 0.01),
            ln2_g=1.0 + nrm((1, d_model), 0.01), ln2_b=nrm((1, d_model), 0.01),
        )
        layers.append(lp)
    return dict(position_enc=pos_enc, layers=layers)


if __name__ == "__main__":
    # model_config-equivalents (small)
    B, T, D = 2, 16, 32                 # batch, seq, encoder_dim
    n_head = 2                          # encoder_head
    d_inner = 64                        # encoder_conv1d_filter_size
    kernels = (9, 1)                    # fft_conv1d_kernels
    n_layers = 2                        # decoder_n_layer
    max_seq_len = 32
    n_position = max_seq_len + 1

    root = jax.random.PRNGKey(0)
    k_param, k_seq = jax.random.split(root)
    params = init_params(k_param, n_position=n_position, d_model=D,
                         d_inner=d_inner, n_layers=n_layers, kernels=kernels)
    stacked = stack_layer_params(params['layers'], n_head=n_head)

    enc_seq = jax.random.normal(k_seq, (B, T, D), dtype=jnp.float32)
    # positions: batch 0 is full length, batch 1 has 4 PAD slots at the end
    pos_np = np.zeros((B, T), dtype=np.int32)
    pos_np[0, :T] = np.arange(1, T + 1)
    pos_np[1, :12] = np.arange(1, 13)
    enc_pos = jnp.asarray(pos_np)

    out = decoder_forward(enc_seq, enc_pos, params['position_enc'], stacked,
                          n_head=n_head, kernels=kernels)
    out = jax.block_until_ready(out)

    ref = decoder_forward_ref(enc_seq, enc_pos, params,
                              n_head=n_head, kernels=kernels)
    # Kernel runs matmuls with bf16 operands (f32 accumulate) + approx
    # reciprocal in softmax; compare against the pure-f32 reference with a
    # tolerance that covers that quantization but still catches real bugs.
    np.testing.assert_allclose(np.asarray(out), np.asarray(ref),
                               rtol=5e-2, atol=5e-2)
    print("KERNEL_OK")
</pallas_src>

<mosaic_0001>
module attributes {stable_mosaic.version = 11 : i64} {
  func.func @decoder_stack_kernel(%arg0: i32, %arg1: i32, %arg2: memref<1x16x32xf32, #tpu.memory_space<vmem>>, %arg3: memref<1x16x1xf32, #tpu.memory_space<vmem>>, %arg4: memref<1x2x32x16xbf16, #tpu.memory_space<vmem>>, %arg5: memref<1x2x1x16xf32, #tpu.memory_space<vmem>>, %arg6: memref<1x2x32x16xbf16, #tpu.memory_space<vmem>>, %arg7: memref<1x2x1x16xf32, #tpu.memory_space<vmem>>, %arg8: memref<1x2x32x16xbf16, #tpu.memory_space<vmem>>, %arg9: memref<1x2x1x16xf32, #tpu.memory_space<vmem>>, %arg10: memref<1x2x16x32xbf16, #tpu.memory_space<vmem>>, %arg11: memref<1x1x32xf32, #tpu.memory_space<vmem>>, %arg12: memref<1x1x32xf32, #tpu.memory_space<vmem>>, %arg13: memref<1x1x32xf32, #tpu.memory_space<vmem>>, %arg14: memref<1x9x32x64xbf16, #tpu.memory_space<vmem>>, %arg15: memref<1x1x64xf32, #tpu.memory_space<vmem>>, %arg16: memref<1x1x64x32xbf16, #tpu.memory_space<vmem>>, %arg17: memref<1x1x32xf32, #tpu.memory_space<vmem>>, %arg18: memref<1x1x32xf32, #tpu.memory_space<vmem>>, %arg19: memref<1x1x32xf32, #tpu.memory_space<vmem>>, %arg20: memref<1x16x32xf32, #tpu.memory_space<vmem>>) attributes {dimension_semantics = [#tpu.dimension_semantics<parallel>, #tpu.dimension_semantics<arbitrary>], iteration_bounds = array<i64: 2, 2>, scalar_prefetch = 0 : i64, scratch_operands = 0 : i64, tpu.core_type = #tpu.core_type<tc>, window_params = [{transform_indices = @transform_0, window_bounds = array<i64: 1, 16, 32>}, {transform_indices = @transform_1, window_bounds = array<i64: 1, 16, 1>}, {transform_indices = @transform_2, window_bounds = array<i64: 1, 2, 32, 16>}, {transform_indices = @transform_3, window_bounds = array<i64: 1, 2, 1, 16>}, {transform_indices = @transform_4, window_bounds = array<i64: 1, 2, 32, 16>}, {transform_indices = @transform_5, window_bounds = array<i64: 1, 2, 1, 16>}, {transform_indices = @transform_6, window_bounds = array<i64: 1, 2, 32, 16>}, {transform_indices = @transform_7, window_bounds = array<i64: 1, 2, 1, 16>}, {transform_indices = @transform_8, window_bounds = array<i64: 1, 2, 16, 32>}, {transform_indices = @transform_9, window_bounds = array<i64: 1, 1, 32>}, {transform_indices = @transform_10, window_bounds = array<i64: 1, 1, 32>}, {transform_indices = @transform_11, window_bounds = array<i64: 1, 1, 32>}, {transform_indices = @transform_12, window_bounds = array<i64: 1, 9, 32, 64>}, {transform_indices = @transform_13, window_bounds = array<i64: 1, 1, 64>}, {transform_indices = @transform_14, window_bounds = array<i64: 1, 1, 64, 32>}, {transform_indices = @transform_15, window_bounds = array<i64: 1, 1, 32>}, {transform_indices = @transform_16, window_bounds = array<i64: 1, 1, 32>}, {transform_indices = @transform_17, window_bounds = array<i64: 1, 1, 32>}, {transform_indices = @transform_18, window_bounds = array<i64: 1, 16, 32>}]} {
    %c0_i32 = arith.constant 0 : i32
    %0 = arith.cmpi eq, %arg1, %c0_i32 : i32
    %1 = arith.extui %0 : i1 to i32
    %c0_i32_0 = arith.constant 0 : i32
    %2 = arith.cmpi ne, %1, %c0_i32_0 : i32
    scf.if %2 {
      %c0_175 = arith.constant 0 : index
      %c0_176 = arith.constant 0 : index
      %c0_177 = arith.constant 0 : index
      %288 = vector.load %arg2[%c0_175, %c0_176, %c0_177] : memref<1x16x32xf32, #tpu.memory_space<vmem>>, vector<1x16x32xf32>
      %c0_178 = arith.constant 0 : index
      %c0_179 = arith.constant 0 : index
      %c0_180 = arith.constant 0 : index
      %289 = vector.load %arg20[%c0_178, %c0_179, %c0_180] : memref<1x16x32xf32, #tpu.memory_space<vmem>>, vector<1x16x32xf32>
      tpu.vector_store %arg20[%c0_178, %c0_179, %c0_180], %288 {strides = array<i32>} : memref<1x16x32xf32, #tpu.memory_space<vmem>>, vector<1x16x32xf32>,
    } else {
    }
    %c0 = arith.constant 0 : index
    %c0_1 = arith.constant 0 : index
    %c0_2 = arith.constant 0 : index
    %3 = vector.load %arg20[%c0, %c0_1, %c0_2] : memref<1x16x32xf32, #tpu.memory_space<vmem>>, vector<1x16x32xf32>
    %4 = vector.shape_cast %3 : vector<1x16x32xf32> to vector<16x32xf32>
    %c0_3 = arith.constant 0 : index
    %c0_4 = arith.constant 0 : index
    %c0_5 = arith.constant 0 : index
    %5 = vector.load %arg3[%c0_3, %c0_4, %c0_5] : memref<1x16x1xf32, #tpu.memory_space<vmem>>, vector<1x16x1xf32>
    %6 = vector.shape_cast %5 : vector<1x16x1xf32> to vector<16x1xf32>
    %7 = arith.truncf %4 : vector<16x32xf32> to vector<16x32xbf16>
    %cst = arith.constant 0.000000e+00 : f32
    %8 = vector.broadcast %cst : f32 to vector<16x32xf32>
    %c0_6 = arith.constant 0 : index
    %c0_7 = arith.constant 0 : index
    %c0_8 = arith.constant 0 : index
    %9 = vector.load %arg11[%c0_6, %c0_7, %c0_8] : memref<1x1x32xf32, #tpu.memory_space<vmem>>, vector<1x1x32xf32>
    %10 = vector.shape_cast %9 : vector<1x1x32xf32> to vector<1x32xf32>
    %11 = vector.broadcast %10 : vector<1x32xf32> to vector<16x32xf32>
    %12 = arith.addf %8, %11 : vector<16x32xf32>
    %c0_9 = arith.constant 0 : index
    %c0_10 = arith.constant 0 : index
    %c0_11 = arith.constant 0 : index
    %c0_12 = arith.constant 0 : index
    %13 = vector.load %arg4[%c0_9, %c0_10, %c0_11, %c0_12] : memref<1x2x32x16xbf16, #tpu.memory_space<vmem>>, vector<1x1x32x16xbf16>
    %14 = vector.shape_cast %13 : vector<1x1x32x16xbf16> to vector<32x16xbf16>
    %cst_13 = arith.constant dense<0.000000e+00> : vector<16x16xf32>
    %15 = tpu.matmul %7, %14, %cst_13 {dimension_numbers = #tpu.dot_dimension_numbers<[1], [0], [0], [1], [0, 0, 1, 1], [], []>} : vector<16x32xbf16>, vector<32x16xbf16>, vector<16x16xf32> -> vector<16x16xf32>
    %c0_14 = arith.constant 0 : index
    %c0_15 = arith.constant 0 : index
    %c0_16 = arith.constant 0 : index
    %c0_17 = arith.constant 0 : index
    %16 = vector.load %arg5[%c0_14, %c0_15, %c0_16, %c0_17] : memref<1x2x1x16xf32, #tpu.memory_space<vmem>>, vector<1x1x1x16xf32>
    %17 = vector.shape_cast %16 : vector<1x1x1x16xf32> to vector<1x16xf32>
    %18 = vector.broadcast %17 : vector<1x16xf32> to vector<16x16xf32>
    %19 = arith.addf %15, %18 : vector<16x16xf32>
    %c0_18 = arith.constant 0 : index
    %c0_19 = arith.constant 0 : index
    %c0_20 = arith.constant 0 : index
    %c0_21 = arith.constant 0 : index
    %20 = vector.load %arg6[%c0_18, %c0_19, %c0_20, %c0_21] : memref<1x2x32x16xbf16, #tpu.memory_space<vmem>>, vector<1x1x32x16xbf16>
    %21 = vector.shape_cast %20 : vector<1x1x32x16xbf16> to vector<32x16xbf16>
    %cst_22 = arith.constant dense<0.000000e+00> : vector<16x16xf32>
    %22 = tpu.matmul %7, %21, %cst_22 {dimension_numbers = #tpu.dot_dimension_numbers<[1], [0], [0], [1], [0, 0, 1, 1], [], []>} : vector<16x32xbf16>, vector<32x16xbf16>, vector<16x16xf32> -> vector<16x16xf32>
    %c0_23 = arith.constant 0 : index
    %c0_24 = arith.constant 0 : index
    %c0_25 = arith.constant 0 : index
    %c0_26 = arith.constant 0 : index
    %23 = vector.load %arg7[%c0_23, %c0_24, %c0_25, %c0_26] : memref<1x2x1x16xf32, #tpu.memory_space<vmem>>, vector<1x1x1x16xf32>
    %24 = vector.shape_cast %23 : vector<1x1x1x16xf32> to vector<1x16xf32>
    %25 = vector.broadcast %24 : vector<1x16xf32> to vector<16x16xf32>
    %26 = arith.addf %22, %25 : vector<16x16xf32>
    %c0_27 = arith.constant 0 : index
    %c0_28 = arith.constant 0 : index
    %c0_29 = arith.constant 0 : index
    %c0_30 = arith.constant 0 : index
    %27 = vector.load %arg8[%c0_27, %c0_28, %c0_29, %c0_30] : memref<1x2x32x16xbf16, #tpu.memory_space<vmem>>, vector<1x1x32x16xbf16>
    %28 = vector.shape_cast %27 : vector<1x1x32x16xbf16> to vector<32x16xbf16>
    %cst_31 = arith.constant dense<0.000000e+00> : vector<16x16xf32>
    %29 = tpu.matmul %7, %28, %cst_31 {dimension_numbers = #tpu.dot_dimension_numbers<[1], [0], [0], [1], [0, 0, 1, 1], [], []>} : vector<16x32xbf16>, vector<32x16xbf16>, vector<16x16xf32> -> vector<16x16xf32>
    %c0_32 = arith.constant 0 : index
    %c0_33 = arith.constant 0 : index
    %c0_34 = arith.constant 0 : index
    %c0_35 = arith.constant 0 : index
    %30 = vector.load %arg9[%c0_32, %c0_33, %c0_34, %c0_35] : memref<1x2x1x16xf32, #tpu.memory_space<vmem>>, vector<1x1x1x16xf32>
    %31 = vector.shape_cast %30 : vector<1x1x1x16xf32> to vector<1x16xf32>
    %32 = vector.broadcast %31 : vector<1x16xf32> to vector<16x16xf32>
    %33 = arith.addf %29, %32 : vector<16x16xf32>
    %34 = arith.truncf %19 : vector<16x16xf32> to vector<16x16xbf16>
    %35 = arith.truncf %26 : vector<16x16xf32> to vector<16x16xbf16>
    %cst_36 = arith.constant dense<0.000000e+00> : vector<16x16xf32>
    %36 = tpu.matmul %34, %35, %cst_36 {dimension_numbers = #tpu.dot_dimension_numbers<[1], [1], [0], [0], [0, 0, 1, 0], [], []>} : vector<16x16xbf16>, vector<16x16xbf16>, vector<16x16xf32> -> vector<16x16xf32>
    %cst_37 = arith.constant 2.500000e-01 : f32
    %37 = vector.broadcast %cst_37 : f32 to vector<16x16xf32>
    %38 = arith.mulf %36, %37 : vector<16x16xf32>
    %cst_38 = arith.constant dense<0xFF800000> : vector<16xf32>
    %39 = vector.multi_reduction <maximumf>, %38, %cst_38 [1] : vector<16x16xf32> to vector<16xf32>
    %40 = vector.shape_cast %39 : vector<16xf32> to vector<16x1xf32>
    %41 = vector.broadcast %40 : vector<16x1xf32> to vector<16x16xf32>
    %42 = arith.subf %38, %41 : vector<16x16xf32>
    %43 = math.exp %42 : vector<16x16xf32>
    %cst_39 = arith.constant dense<0.000000e+00> : vector<16xf32>
    %44 = vector.multi_reduction <add>, %43, %cst_39 [1] : vector<16x16xf32> to vector<16xf32>
    %45 = vector.shape_cast %44 : vector<16xf32> to vector<16x1xf32>
    %46 = tpu.reciprocal %45 {approx = true} : vector<16x1xf32> -> vector<16x1xf32>
    %47 = vector.broadcast %46 : vector<16x1xf32> to vector<16x16xf32>
    %48 = arith.mulf %43, %47 : vector<16x16xf32>
    %49 = arith.truncf %48 : vector<16x16xf32> to vector<16x16xbf16>
    %50 = arith.truncf %33 : vector<16x16xf32> to vector<16x16xbf16>
    %cst_40 = arith.constant dense<0.000000e+00> : vector<16x16xf32>
    %51 = tpu.matmul %49, %50, %cst_40 {dimension_numbers = #tpu.dot_dimension_numbers<[1], [0], [0], [1], [0, 0, 1, 1], [], []>} : vector<16x16xbf16>, vector<16x16xbf16>, vector<16x16xf32> -> vector<16x16xf32>
    %52 = arith.truncf %51 : vector<16x16xf32> to vector<16x16xbf16>
    %c0_41 = arith.constant 0 : index
    %c0_42 = arith.constant 0 : index
    %c0_43 = arith.constant 0 : index
    %c0_44 = arith.constant 0 : index
    %53 = vector.load %arg10[%c0_41, %c0_42, %c0_43, %c0_44] : memref<1x2x16x32xbf16, #tpu.memory_space<vmem>>, vector<1x1x16x32xbf16>
    %54 = vector.shape_cast %53 : vector<1x1x16x32xbf16> to vector<16x32xbf16>
    %cst_45 = arith.constant dense<0.000000e+00> : vector<16x32xf32>
    %55 = tpu.matmul %52, %54, %cst_45 {dimension_numbers = #tpu.dot_dimension_numbers<[1], [0], [0], [1], [0, 0, 1, 1], [], []>} : vector<16x16xbf16>, vector<16x32xbf16>, vector<16x32xf32> -> vector<16x32xf32>
    %56 = arith.addf %12, %55 : vector<16x32xf32>
    %c0_46 = arith.constant 0 : index
    %c1 = arith.constant 1 : index
    %c0_47 = arith.constant 0 : index
    %c0_48 = arith.constant 0 : index
    %57 = vector.load %arg4[%c0_46, %c1, %c0_47, %c0_48] : memref<1x2x32x16xbf16, #tpu.memory_space<vmem>>, vector<1x1x32x16xbf16>
    %58 = vector.shape_cast %57 : vector<1x1x32x16xbf16> to vector<32x16xbf16>
    %cst_49 = arith.constant dense<0.000000e+00> : vector<16x16xf32>
    %59 = tpu.matmul %7, %58, %cst_49 {dimension_numbers = #tpu.dot_dimension_numbers<[1], [0], [0], [1], [0, 0, 1, 1], [], []>} : vector<16x32xbf16>, vector<32x16xbf16>, vector<16x16xf32> -> vector<16x16xf32>
    %c0_50 = arith.constant 0 : index
    %c1_51 = arith.constant 1 : index
    %c0_52 = arith.constant 0 : index
    %c0_53 = arith.constant 0 : index
    %60 = vector.load %arg5[%c0_50, %c1_51, %c0_52, %c0_53] : memref<1x2x1x16xf32, #tpu.memory_space<vmem>>, vector<1x1x1x16xf32>
    %61 = vector.shape_cast %60 : vector<1x1x1x16xf32> to vector<1x16xf32>
    %62 = vector.broadcast %61 : vector<1x16xf32> to vector<16x16xf32>
    %63 = arith.addf %59, %62 : vector<16x16xf32>
    %c0_54 = arith.constant 0 : index
    %c1_55 = arith.constant 1 : index
    %c0_56 = arith.constant 0 : index
    %c0_57 = arith.constant 0 : index
    %64 = vector.load %arg6[%c0_54, %c1_55, %c0_56, %c0_57] : memref<1x2x32x16xbf16, #tpu.memory_space<vmem>>, vector<1x1x32x16xbf16>
    %65 = vector.shape_cast %64 : vector<1x1x32x16xbf16> to vector<32x16xbf16>
    %cst_58 = arith.constant dense<0.000000e+00> : vector<16x16xf32>
    %66 = tpu.matmul %7, %65, %cst_58 {dimension_numbers = #tpu.dot_dimension_numbers<[1], [0], [0], [1], [0, 0, 1, 1], [], []>} : vector<16x32xbf16>, vector<32x16xbf16>, vector<16x16xf32> -> vector<16x16xf32>
    %c0_59 = arith.constant 0 : index
    %c1_60 = arith.constant 1 : index
    %c0_61 = arith.constant 0 : index
    %c0_62 = arith.constant 0 : index
    %67 = vector.load %arg7[%c0_59, %c1_60, %c0_61, %c0_62] : memref<1x2x1x16xf32, #tpu.memory_space<vmem>>, vector<1x1x1x16xf32>
    %68 = vector.shape_cast %67 : vector<1x1x1x16xf32> to vector<1x16xf32>
    %69 = vector.broadcast %68 : vector<1x16xf32> to vector<16x16xf32>
    %70 = arith.addf %66, %69 : vector<16x16xf32>
    %c0_63 = arith.constant 0 : index
    %c1_64 = arith.constant 1 : index
    %c0_65 = arith.constant 0 : index
    %c0_66 = arith.constant 0 : index
    %71 = vector.load %arg8[%c0_63, %c1_64, %c0_65, %c0_66] : memref<1x2x32x16xbf16, #tpu.memory_space<vmem>>, vector<1x1x32x16xbf16>
    %72 = vector.shape_cast %71 : vector<1x1x32x16xbf16> to vector<32x16xbf16>
    %cst_67 = arith.constant dense<0.000000e+00> : vector<16x16xf32>
    %73 = tpu.matmul %7, %72, %cst_67 {dimension_numbers = #tpu.dot_dimension_numbers<[1], [0], [0], [1], [0, 0, 1, 1], [], []>} : vector<16x32xbf16>, vector<32x16xbf16>, vector<16x16xf32> -> vector<16x16xf32>
    %c0_68 = arith.constant 0 : index
    %c1_69 = arith.constant 1 : index
    %c0_70 = arith.constant 0 : index
    %c0_71 = arith.constant 0 : index
    %74 = vector.load %arg9[%c0_68, %c1_69, %c0_70, %c0_71] : memref<1x2x1x16xf32, #tpu.memory_space<vmem>>, vector<1x1x1x16xf32>
    %75 = vector.shape_cast %74 : vector<1x1x1x16xf32> to vector<1x16xf32>
    %76 = vector.broadcast %75 : vector<1x16xf32> to vector<16x16xf32>
    %77 = arith.addf %73, %76 : vector<16x16xf32>
    %78 = arith.truncf %63 : vector<16x16xf32> to vector<16x16xbf16>
    %79 = arith.truncf %70 : vector<16x16xf32> to vector<16x16xbf16>
    %cst_72 = arith.constant dense<0.000000e+00> : vector<16x16xf32>
    %80 = tpu.matmul %78, %79, %cst_72 {dimension_numbers = #tpu.dot_dimension_numbers<[1], [1], [0], [0], [0, 0, 1, 0], [], []>} : vector<16x16xbf16>, vector<16x16xbf16>, vector<16x16xf32> -> vector<16x16xf32>
    %cst_73 = arith.constant 2.500000e-01 : f32
    %81 = vector.broadcast %cst_73 : f32 to vector<16x16xf32>
    %82 = arith.mulf %80, %81 : vector<16x16xf32>
    %cst_74 = arith.constant dense<0xFF800000> : vector<16xf32>
    %83 = vector.multi_reduction <maximumf>, %82, %cst_74 [1] : vector<16x16xf32> to vector<16xf32>
    %84 = vector.shape_cast %83 : vector<16xf32> to vector<16x1xf32>
    %85 = vector.broadcast %84 : vector<16x1xf32> to vector<16x16xf32>
    %86 = arith.subf %82, %85 : vector<16x16xf32>
    %87 = math.exp %86 : vector<16x16xf32>
    %cst_75 = arith.constant dense<0.000000e+00> : vector<16xf32>
    %88 = vector.multi_reduction <add>, %87, %cst_75 [1] : vector<16x16xf32> to vector<16xf32>
    %89 = vector.shape_cast %88 : vector<16xf32> to vector<16x1xf32>
    %90 = tpu.reciprocal %89 {approx = true} : vector<16x1xf32> -> vector<16x1xf32>
    %91 = vector.broadcast %90 : vector<16x1xf32> to vector<16x16xf32>
    %92 = arith.mulf %87, %91 : vector<16x16xf32>
    %93 = arith.truncf %92 : vector<16x16xf32> to vector<16x16xbf16>
    %94 = arith.truncf %77 : vector<16x16xf32> to vector<16x16xbf16>
    %cst_76 = arith.constant dense<0.000000e+00> : vector<16x16xf32>
    %95 = tpu.matmul %93, %94, %cst_76 {dimension_numbers = #tpu.dot_dimension_numbers<[1], [0], [0], [1], [0, 0, 1, 1], [], []>} : vector<16x16xbf16>, vector<16x16xbf16>, vector<16x16xf32> -> vector<16x16xf32>
    %96 = arith.truncf %95 : vector<16x16xf32> to vector<16x16xbf16>
    %c0_77 = arith.constant 0 : index
    %c1_78 = arith.constant 1 : index
    %c0_79 = arith.constant 0 : index
    %c0_80 = arith.constant 0 : index
    %97 = vector.load %arg10[%c0_77, %c1_78, %c0_79, %c0_80] : memref<1x2x16x32xbf16, #tpu.memory_space<vmem>>, vector<1x1x16x32xbf16>
    %98 = vector.shape_cast %97 : vector<1x1x16x32xbf16> to vector<16x32xbf16>
    %cst_81 = arith.constant dense<0.000000e+00> : vector<16x32xf32>
    %99 = tpu.matmul %96, %98, %cst_81 {dimension_numbers = #tpu.dot_dimension_numbers<[1], [0], [0], [1], [0, 0, 1, 1], [], []>} : vector<16x16xbf16>, vector<16x32xbf16>, vector<16x32xf32> -> vector<16x32xf32>
    %100 = arith.addf %56, %99 : vector<16x32xf32>
    %101 = arith.addf %100, %4 : vector<16x32xf32>
    %c0_82 = arith.constant 0 : index
    %c0_83 = arith.constant 0 : index
    %c0_84 = arith.constant 0 : index
    %102 = vector.load %arg12[%c0_82, %c0_83, %c0_84] : memref<1x1x32xf32, #tpu.memory_space<vmem>>, vector<1x1x32xf32>
    %103 = vector.shape_cast %102 : vector<1x1x32xf32> to vector<1x32xf32>
    %c0_85 = arith.constant 0 : index
    %c0_86 = arith.constant 0 : index
    %c0_87 = arith.constant 0 : index
    %104 = vector.load %arg13[%c0_85, %c0_86, %c0_87] : memref<1x1x32xf32, #tpu.memory_space<vmem>>, vector<1x1x32xf32>
    %105 = vector.shape_cast %104 : vector<1x1x32xf32> to vector<1x32xf32>
    %cst_88 = arith.constant dense<0.000000e+00> : vector<16xf32>
    %106 = vector.multi_reduction <add>, %101, %cst_88 [1] : vector<16x32xf32> to vector<16xf32>
    %107 = vector.shape_cast %106 : vector<16xf32> to vector<16x1xf32>
    %cst_89 = arith.constant 3.200000e+01 : f32
    %108 = vector.broadcast %cst_89 : f32 to vector<16x1xf32>
    %109 = arith.divf %107, %108 : vector<16x1xf32>
    %110 = vector.broadcast %109 : vector<16x1xf32> to vector<16x32xf32>
    %111 = arith.subf %101, %110 : vector<16x32xf32>
    %112 = arith.mulf %111, %111 : vector<16x32xf32>
    %cst_90 = arith.constant dense<0.000000e+00> : vector<16xf32>
    %113 = vector.multi_reduction <add>, %112, %cst_90 [1] : vector<16x32xf32> to vector<16xf32>
    %114 = vector.shape_cast %113 : vector<16xf32> to vector<16x1xf32>
    %cst_91 = arith.constant 3.200000e+01 : f32
    %115 = vector.broadcast %cst_91 : f32 to vector<16x1xf32>
    %116 = arith.divf %114, %115 : vector<16x1xf32>
    %117 = vector.broadcast %109 : vector<16x1xf32> to vector<16x32xf32>
    %118 = arith.subf %101, %117 : vector<16x32xf32>
    %cst_92 = arith.constant 9.99999974E-6 : f32
    %119 = vector.broadcast %cst_92 : f32 to vector<16x1xf32>
    %120 = arith.addf %116, %119 : vector<16x1xf32>
    %121 = math.rsqrt %120 : vector<16x1xf32>
    %122 = vector.broadcast %121 : vector<16x1xf32> to vector<16x32xf32>
    %123 = arith.mulf %118, %122 : vector<16x32xf32>
    %124 = vector.broadcast %103 : vector<1x32xf32> to vector<16x32xf32>
    %125 = arith.mulf %123, %124 : vector<16x32xf32>
    %126 = vector.broadcast %105 : vector<1x32xf32> to vector<16x32xf32>
    %127 = arith.addf %125, %126 : vector<16x32xf32>
    %128 = vector.broadcast %6 : vector<16x1xf32> to vector<16x32xf32>
    %129 = arith.mulf %127, %128 : vector<16x32xf32>
    %cst_93 = arith.constant 0.000000e+00 : f32
    %130 = vector.broadcast %cst_93 : f32 to vector<16x64xf32>
    %c0_94 = arith.constant 0 : index
    %c0_95 = arith.constant 0 : index
    %c0_96 = arith.constant 0 : index
    %131 = vector.load %arg15[%c0_94, %c0_95, %c0_96] : memref<1x1x64xf32, #tpu.memory_space<vmem>>, vector<1x1x64xf32>
    %132 = vector.shape_cast %131 : vector<1x1x64xf32> to vector<1x64xf32>
    %133 = vector.broadcast %132 : vector<1x64xf32> to vector<16x64xf32>
    %134 = arith.addf %130, %133 : vector<16x64xf32>
    %c4_i32 = arith.constant 4 : i32
    %135 = tpu.dynamic_rotate %129 by %c4_i32 dim 0 : vector<16x32xf32>, i32 -> vector<16x32xf32>
    %136 = tpu.iota {dimensions = array<i32: 0>} : vector<16x1xi32>
    %c4_i32_97 = arith.constant 4 : i32
    %137 = vector.broadcast %c4_i32_97 : i32 to vector<16x1xi32>
    %138 = arith.cmpi sge, %136, %137 : vector<16x1xi32>
    %cst_98 = arith.constant 0.000000e+00 : f32
    %139 = vector.shape_cast %138 : vector<16x1xi1> to vector<16x1xi1>
    %140 = vector.broadcast %139 : vector<16x1xi1> to vector<16x32xi1>
    %141 = vector.broadcast %cst_98 : f32 to vector<16x32xf32>
    %142 = arith.select %140, %135, %141 : vector<16x32xi1>, vector<16x32xf32>
    %143 = arith.truncf %142 : vector<16x32xf32> to vector<16x32xbf16>
    %c0_99 = arith.constant 0 : index
    %c0_100 = arith.constant 0 : index
    %c0_101 = arith.constant 0 : index
    %c0_102 = arith.constant 0 : index
    %144 = vector.load %arg14[%c0_99, %c0_100, %c0_101, %c0_102] : memref<1x9x32x64xbf16, #tpu.memory_space<vmem>>, vector<1x1x32x64xbf16>
    %145 = vector.shape_cast %144 : vector<1x1x32x64xbf16> to vector<32x64xbf16>
    %cst_103 = arith.constant dense<0.000000e+00> : vector<16x64xf32>
    %146 = tpu.matmul %143, %145, %cst_103 {dimension_numbers = #tpu.dot_dimension_numbers<[1], [0], [0], [1], [0, 0, 1, 1], [], []>} : vector<16x32xbf16>, vector<32x64xbf16>, vector<16x64xf32> -> vector<16x64xf32>
    %147 = arith.addf %134, %146 : vector<16x64xf32>
    %c3_i32 = arith.constant 3 : i32
    %148 = tpu.dynamic_rotate %129 by %c3_i32 dim 0 : vector<16x32xf32>, i32 -> vector<16x32xf32>
    %149 = tpu.iota {dimensions = array<i32: 0>} : vector<16x1xi32>
    %c3_i32_104 = arith.constant 3 : i32
    %150 = vector.broadcast %c3_i32_104 : i32 to vector<16x1xi32>
    %151 = arith.cmpi sge, %149, %150 : vector<16x1xi32>
    %cst_105 = arith.constant 0.000000e+00 : f32
    %152 = vector.shape_cast %151 : vector<16x1xi1> to vector<16x1xi1>
    %153 = vector.broadcast %152 : vector<16x1xi1> to vector<16x32xi1>
    %154 = vector.broadcast %cst_105 : f32 to vector<16x32xf32>
    %155 = arith.select %153, %148, %154 : vector<16x32xi1>, vector<16x32xf32>
    %156 = arith.truncf %155 : vector<16x32xf32> to vector<16x32xbf16>
    %c0_106 = arith.constant 0 : index
    %c1_107 = arith.constant 1 : index
    %c0_108 = arith.constant 0 : index
    %c0_109 = arith.constant 0 : index
    %157 = vector.load %arg14[%c0_106, %c1_107, %c0_108, %c0_109] : memref<1x9x32x64xbf16, #tpu.memory_space<vmem>>, vector<1x1x32x64xbf16>
    %158 = vector.shape_cast %157 : vector<1x1x32x64xbf16> to vector<32x64xbf16>
    %cst_110 = arith.constant dense<0.000000e+00> : vector<16x64xf32>
    %159 = tpu.matmul %156, %158, %cst_110 {dimension_numbers = #tpu.dot_dimension_numbers<[1], [0], [0], [1], [0, 0, 1, 1], [], []>} : vector<16x32xbf16>, vector<32x64xbf16>, vector<16x64xf32> -> vector<16x64xf32>
    %160 = arith.addf %147, %159 : vector<16x64xf32>
    %c2_i32 = arith.constant 2 : i32
    %161 = tpu.dynamic_rotate %129 by %c2_i32 dim 0 : vector<16x32xf32>, i32 -> vector<16x32xf32>
    %162 = tpu.iota {dimensions = array<i32: 0>} : vector<16x1xi32>
    %c2_i32_111 = arith.constant 2 : i32
    %163 = vector.broadcast %c2_i32_111 : i32 to vector<16x1xi32>
    %164 = arith.cmpi sge, %162, %163 : vector<16x1xi32>
    %cst_112 = arith.constant 0.000000e+00 : f32
    %165 = vector.shape_cast %164 : vector<16x1xi1> to vector<16x1xi1>
    %166 = vector.broadcast %165 : vector<16x1xi1> to vector<16x32xi1>
    %167 = vector.broadcast %cst_112 : f32 to vector<16x32xf32>
    %168 = arith.select %166, %161, %167 : vector<16x32xi1>, vector<16x32xf32>
    %169 = arith.truncf %168 : vector<16x32xf32> to vector<16x32xbf16>
    %c0_113 = arith.constant 0 : index
    %c2 = arith.constant 2 : index
    %c0_114 = arith.constant 0 : index
    %c0_115 = arith.constant 0 : index
    %170 = vector.load %arg14[%c0_113, %c2, %c0_114, %c0_115] : memref<1x9x32x64xbf16, #tpu.memory_space<vmem>>, vector<1x1x32x64xbf16>
    %171 = vector.shape_cast %170 : vector<1x1x32x64xbf16> to vector<32x64xbf16>
    %cst_116 = arith.constant dense<0.000000e+00> : vector<16x64xf32>
    %172 = tpu.matmul %169, %171, %cst_116 {dimension_numbers = #tpu.dot_dimension_numbers<[1], [0], [0], [1], [0, 0, 1, 1], [], []>} : vector<16x32xbf16>, vector<32x64xbf16>, vector<16x64xf32> -> vector<16x64xf32>
    %173 = arith.addf %160, %172 : vector<16x64xf32>
    %c1_i32 = arith.constant 1 : i32
    %174 = tpu.dynamic_rotate %129 by %c1_i32 dim 0 : vector<16x32xf32>, i32 -> vector<16x32xf32>
    %175 = tpu.iota {dimensions = array<i32: 0>} : vector<16x1xi32>
    %c1_i32_117 = arith.constant 1 : i32
    %176 = vector.broadcast %c1_i32_117 : i32 to vector<16x1xi32>
    %177 = arith.cmpi sge, %175, %176 : vector<16x1xi32>
    %cst_118 = arith.constant 0.000000e+00 : f32
    %178 = vector.shape_cast %177 : vector<16x1xi1> to vector<16x1xi1>
    %179 = vector.broadcast %178 : vector<16x1xi1> to vector<16x32xi1>
    %180 = vector.broadcast %cst_118 : f32 to vector<16x32xf32>
    %181 = arith.select %179, %174, %180 : vector<16x32xi1>, vector<16x32xf32>
    %182 = arith.truncf %181 : vector<16x32xf32> to vector<16x32xbf16>
    %c0_119 = arith.constant 0 : index
    %c3 = arith.constant 3 : index
    %c0_120 = arith.constant 0 : index
    %c0_121 = arith.constant 0 : index
    %183 = vector.load %arg14[%c0_119, %c3, %c0_120, %c0_121] : memref<1x9x32x64xbf16, #tpu.memory_space<vmem>>, vector<1x1x32x64xbf16>
    %184 = vector.shape_cast %183 : vector<1x1x32x64xbf16> to vector<32x64xbf16>
    %cst_122 = arith.constant dense<0.000000e+00> : vector<16x64xf32>
    %185 = tpu.matmul %182, %184, %cst_122 {dimension_numbers = #tpu.dot_dimension_numbers<[1], [0], [0], [1], [0, 0, 1, 1], [], []>} : vector<16x32xbf16>, vector<32x64xbf16>, vector<16x64xf32> -> vector<16x64xf32>
    %186 = arith.addf %173, %185 : vector<16x64xf32>
    %187 = arith.truncf %129 : vector<16x32xf32> to vector<16x32xbf16>
    %c0_123 = arith.constant 0 : index
    %c4 = arith.constant 4 : index
    %c0_124 = arith.constant 0 : index
    %c0_125 = arith.constant 0 : index
    %188 = vector.load %arg14[%c0_123, %c4, %c0_124, %c0_125] : memref<1x9x32x64xbf16, #tpu.memory_space<vmem>>, vector<1x1x32x64xbf16>
    %189 = vector.shape_cast %188 : vector<1x1x32x64xbf16> to vector<32x64xbf16>
    %cst_126 = arith.constant dense<0.000000e+00> : vector<16x64xf32>
    %190 = tpu.matmul %187, %189, %cst_126 {dimension_numbers = #tpu.dot_dimension_numbers<[1], [0], [0], [1], [0, 0, 1, 1], [], []>} : vector<16x32xbf16>, vector<32x64xbf16>, vector<16x64xf32> -> vector<16x64xf32>
    %191 = arith.addf %186, %190 : vector<16x64xf32>
    %c15_i32 = arith.constant 15 : i32
    %192 = tpu.dynamic_rotate %129 by %c15_i32 dim 0 : vector<16x32xf32>, i32 -> vector<16x32xf32>
    %193 = tpu.iota {dimensions = array<i32: 0>} : vector<16x1xi32>
    %c15_i32_127 = arith.constant 15 : i32
    %194 = vector.broadcast %c15_i32_127 : i32 to vector<16x1xi32>
    %195 = arith.cmpi slt, %193, %194 : vector<16x1xi32>
    %cst_128 = arith.constant 0.000000e+00 : f32
    %196 = vector.shape_cast %195 : vector<16x1xi1> to vector<16x1xi1>
    %197 = vector.broadcast %196 : vector<16x1xi1> to vector<16x32xi1>
    %198 = vector.broadcast %cst_128 : f32 to vector<16x32xf32>
    %199 = arith.select %197, %192, %198 : vector<16x32xi1>, vector<16x32xf32>
    %200 = arith.truncf %199 : vector<16x32xf32> to vector<16x32xbf16>
    %c0_129 = arith.constant 0 : index
    %c5 = arith.constant 5 : index
    %c0_130 = arith.constant 0 : index
    %c0_131 = arith.constant 0 : index
    %201 = vector.load %arg14[%c0_129, %c5, %c0_130, %c0_131] : memref<1x9x32x64xbf16, #tpu.memory_space<vmem>>, vector<1x1x32x64xbf16>
    %202 = vector.shape_cast %201 : vector<1x1x32x64xbf16> to vector<32x64xbf16>
    %cst_132 = arith.constant dense<0.000000e+00> : vector<16x64xf32>
    %203 = tpu.matmul %200, %202, %cst_132 {dimension_numbers = #tpu.dot_dimension_numbers<[1], [0], [0], [1], [0, 0, 1, 1], [], []>} : vector<16x32xbf16>, vector<32x64xbf16>, vector<16x64xf32> -> vector<16x64xf32>
    %204 = arith.addf %191, %203 : vector<16x64xf32>
    %c14_i32 = arith.constant 14 : i32
    %205 = tpu.dynamic_rotate %129 by %c14_i32 dim 0 : vector<16x32xf32>, i32 -> vector<16x32xf32>
    %206 = tpu.iota {dimensions = array<i32: 0>} : vector<16x1xi32>
    %c14_i32_133 = arith.constant 14 : i32
    %207 = vector.broadcast %c14_i32_133 : i32 to vector<16x1xi32>
    %208 = arith.cmpi slt, %206, %207 : vector<16x1xi32>
    %cst_134 = arith.constant 0.000000e+00 : f32
    %209 = vector.shape_cast %208 : vector<16x1xi1> to vector<16x1xi1>
    %210 = vector.broadcast %209 : vector<16x1xi1> to vector<16x32xi1>
    %211 = vector.broadcast %cst_134 : f32 to vector<16x32xf32>
    %212 = arith.select %210, %205, %211 : vector<16x32xi1>, vector<16x32xf32>
    %213 = arith.truncf %212 : vector<16x32xf32> to vector<16x32xbf16>
    %c0_135 = arith.constant 0 : index
    %c6 = arith.constant 6 : index
    %c0_136 = arith.constant 0 : index
    %c0_137 = arith.constant 0 : index
    %214 = vector.load %arg14[%c0_135, %c6, %c0_136, %c0_137] : memref<1x9x32x64xbf16, #tpu.memory_space<vmem>>, vector<1x1x32x64xbf16>
    %215 = vector.shape_cast %214 : vector<1x1x32x64xbf16> to vector<32x64xbf16>
    %cst_138 = arith.constant dense<0.000000e+00> : vector<16x64xf32>
    %216 = tpu.matmul %213, %215, %cst_138 {dimension_numbers = #tpu.dot_dimension_numbers<[1], [0], [0], [1], [0, 0, 1, 1], [], []>} : vector<16x32xbf16>, vector<32x64xbf16>, vector<16x64xf32> -> vector<16x64xf32>
    %217 = arith.addf %204, %216 : vector<16x64xf32>
    %c13_i32 = arith.constant 13 : i32
    %218 = tpu.dynamic_rotate %129 by %c13_i32 dim 0 : vector<16x32xf32>, i32 -> vector<16x32xf32>
    %219 = tpu.iota {dimensions = array<i32: 0>} : vector<16x1xi32>
    %c13_i32_139 = arith.constant 13 : i32
    %220 = vector.broadcast %c13_i32_139 : i32 to vector<16x1xi32>
    %221 = arith.cmpi slt, %219, %220 : vector<16x1xi32>
    %cst_140 = arith.constant 0.000000e+00 : f32
    %222 = vector.shape_cast %221 : vector<16x1xi1> to vector<16x1xi1>
    %223 = vector.broadcast %222 : vector<16x1xi1> to vector<16x32xi1>
    %224 = vector.broadcast %cst_140 : f32 to vector<16x32xf32>
    %225 = arith.select %223, %218, %224 : vector<16x32xi1>, vector<16x32xf32>
    %226 = arith.truncf %225 : vector<16x32xf32> to vector<16x32xbf16>
    %c0_141 = arith.constant 0 : index
    %c7 = arith.constant 7 : index
    %c0_142 = arith.constant 0 : index
    %c0_143 = arith.constant 0 : index
    %227 = vector.load %arg14[%c0_141, %c7, %c0_142, %c0_143] : memref<1x9x32x64xbf16, #tpu.memory_space<vmem>>, vector<1x1x32x64xbf16>
    %228 = vector.shape_cast %227 : vector<1x1x32x64xbf16> to vector<32x64xbf16>
    %cst_144 = arith.constant dense<0.000000e+00> : vector<16x64xf32>
    %229 = tpu.matmul %226, %228, %cst_144 {dimension_numbers = #tpu.dot_dimension_numbers<[1], [0], [0], [1], [0, 0, 1, 1], [], []>} : vector<16x32xbf16>, vector<32x64xbf16>, vector<16x64xf32> -> vector<16x64xf32>
    %230 = arith.addf %217, %229 : vector<16x64xf32>
    %c12_i32 = arith.constant 12 : i32
    %231 = tpu.dynamic_rotate %129 by %c12_i32 dim 0 : vector<16x32xf32>, i32 -> vector<16x32xf32>
    %232 = tpu.iota {dimensions = array<i32: 0>} : vector<16x1xi32>
    %c12_i32_145 = arith.constant 12 : i32
    %233 = vector.broadcast %c12_i32_145 : i32 to vector<16x1xi32>
    %234 = arith.cmpi slt, %232, %233 : vector<16x1xi32>
    %cst_146 = arith.constant 0.000000e+00 : f32
    %235 = vector.shape_cast %234 : vector<16x1xi1> to vector<16x1xi1>
    %236 = vector.broadcast %235 : vector<16x1xi1> to vector<16x32xi1>
    %237 = vector.broadcast %cst_146 : f32 to vector<16x32xf32>
    %238 = arith.select %236, %231, %237 : vector<16x32xi1>, vector<16x32xf32>
    %239 = arith.truncf %238 : vector<16x32xf32> to vector<16x32xbf16>
    %c0_147 = arith.constant 0 : index
    %c8 = arith.constant 8 : index
    %c0_148 = arith.constant 0 : index
    %c0_149 = arith.constant 0 : index
    %240 = vector.load %arg14[%c0_147, %c8, %c0_148, %c0_149] : memref<1x9x32x64xbf16, #tpu.memory_space<vmem>>, vector<1x1x32x64xbf16>
    %241 = vector.shape_cast %240 : vector<1x1x32x64xbf16> to vector<32x64xbf16>
    %cst_150 = arith.constant dense<0.000000e+00> : vector<16x64xf32>
    %242 = tpu.matmul %239, %241, %cst_150 {dimension_numbers = #tpu.dot_dimension_numbers<[1], [0], [0], [1], [0, 0, 1, 1], [], []>} : vector<16x32xbf16>, vector<32x64xbf16>, vector<16x64xf32> -> vector<16x64xf32>
    %243 = arith.addf %230, %242 : vector<16x64xf32>
    %cst_151 = arith.constant 0.000000e+00 : f32
    %244 = vector.broadcast %cst_151 : f32 to vector<16x64xf32>
    %245 = arith.maximumf %243, %244 : vector<16x64xf32>
    %cst_152 = arith.constant 0.000000e+00 : f32
    %246 = vector.broadcast %cst_152 : f32 to vector<16x32xf32>
    %c0_153 = arith.constant 0 : index
    %c0_154 = arith.constant 0 : index
    %c0_155 = arith.constant 0 : index
    %247 = vector.load %arg17[%c0_153, %c0_154, %c0_155] : memref<1x1x32xf32, #tpu.memory_space<vmem>>, vector<1x1x32xf32>
    %248 = vector.shape_cast %247 : vector<1x1x32xf32> to vector<1x32xf32>
    %249 = vector.broadcast %248 : vector<1x32xf32> to vector<16x32xf32>
    %250 = arith.addf %246, %249 : vector<16x32xf32>
    %251 = arith.truncf %245 : vector<16x64xf32> to vector<16x64xbf16>
    %c0_156 = arith.constant 0 : index
    %c0_157 = arith.constant 0 : index
    %c0_158 = arith.constant 0 : index
    %c0_159 = arith.constant 0 : index
    %252 = vector.load %arg16[%c0_156, %c0_157, %c0_158, %c0_159] : memref<1x1x64x32xbf16, #tpu.memory_space<vmem>>, vector<1x1x64x32xbf16>
    %253 = vector.shape_cast %252 : vector<1x1x64x32xbf16> to vector<64x32xbf16>
    %cst_160 = arith.constant dense<0.000000e+00> : vector<16x32xf32>
    %254 = tpu.matmul %251, %253, %cst_160 {dimension_numbers = #tpu.dot_dimension_numbers<[1], [0], [0], [1], [0, 0, 1, 1], [], []>} : vector<16x64xbf16>, vector<64x32xbf16>, vector<16x32xf32> -> vector<16x32xf32>
    %255 = arith.addf %250, %254 : vector<16x32xf32>
    %256 = arith.addf %255, %129 : vector<16x32xf32>
    %c0_161 = arith.constant 0 : index
    %c0_162 = arith.constant 0 : index
    %c0_163 = arith.constant 0 : index
    %257 = vector.load %arg18[%c0_161, %c0_162, %c0_163] : memref<1x1x32xf32, #tpu.memory_space<vmem>>, vector<1x1x32xf32>
    %258 = vector.shape_cast %257 : vector<1x1x32xf32> to vector<1x32xf32>
    %c0_164 = arith.constant 0 : index
    %c0_165 = arith.constant 0 : index
    %c0_166 = arith.constant 0 : index
    %259 = vector.load %arg19[%c0_164, %c0_165, %c0_166] : memref<1x1x32xf32, #tpu.memory_space<vmem>>, vector<1x1x32xf32>
    %260 = vector.shape_cast %259 : vector<1x1x32xf32> to vector<1x32xf32>
    %cst_167 = arith.constant dense<0.000000e+00> : vector<16xf32>
    %261 = vector.multi_reduction <add>, %256, %cst_167 [1] : vector<16x32xf32> to vector<16xf32>
    %262 = vector.shape_cast %261 : vector<16xf32> to vector<16x1xf32>
    %cst_168 = arith.constant 3.200000e+01 : f32
    %263 = vector.broadcast %cst_168 : f32 to vector<16x1xf32>
    %264 = arith.divf %262, %263 : vector<16x1xf32>
    %265 = vector.broadcast %264 : vector<16x1xf32> to vector<16x32xf32>
    %266 = arith.subf %256, %265 : vector<16x32xf32>
    %267 = arith.mulf %266, %266 : vector<16x32xf32>
    %cst_169 = arith.constant dense<0.000000e+00> : vector<16xf32>
    %268 = vector.multi_reduction <add>, %267, %cst_169 [1] : vector<16x32xf32> to vector<16xf32>
    %269 = vector.shape_cast %268 : vector<16xf32> to vector<16x1xf32>
    %cst_170 = arith.constant 3.200000e+01 : f32
    %270 = vector.broadcast %cst_170 : f32 to vector<16x1xf32>
    %271 = arith.divf %269, %270 : vector<16x1xf32>
    %272 = vector.broadcast %264 : vector<16x1xf32> to vector<16x32xf32>
    %273 = arith.subf %256, %272 : vector<16x32xf32>
    %cst_171 = arith.constant 9.99999974E-6 : f32
    %274 = vector.broadcast %cst_171 : f32 to vector<16x1xf32>
    %275 = arith.addf %271, %274 : vector<16x1xf32>
    %276 = math.rsqrt %275 : vector<16x1xf32>
    %277 = vector.broadcast %276 : vector<16x1xf32> to vector<16x32xf32>
    %278 = arith.mulf %273, %277 : vector<16x32xf32>
    %279 = vector.broadcast %258 : vector<1x32xf32> to vector<16x32xf32>
    %280 = arith.mulf %278, %279 : vector<16x32xf32>
    %281 = vector.broadcast %260 : vector<1x32xf32> to vector<16x32xf32>
    %282 = arith.addf %280, %281 : vector<16x32xf32>
    %283 = vector.broadcast %6 : vector<16x1xf32> to vector<16x32xf32>
    %284 = arith.mulf %282, %283 : vector<16x32xf32>
    %c0_172 = arith.constant 0 : index
    %c0_173 = arith.constant 0 : index
    %c0_174 = arith.constant 0 : index
    %285 = vector.load %arg20[%c0_172, %c0_173, %c0_174] : memref<1x16x32xf32, #tpu.memory_space<vmem>>, vector<1x16x32xf32>
    %286 = vector.shape_cast %285 : vector<1x16x32xf32> to vector<16x32xf32>
    %287 = vector.shape_cast %284 : vector<16x32xf32> to vector<1x16x32xf32>
    tpu.vector_store %arg20[%c0_172, %c0_173, %c0_174], %287 {strides = array<i32>} : memref<1x16x32xf32, #tpu.memory_space<vmem>>, vector<1x16x32xf32>,
    return
  }
  func.func @transform_0(%arg0: i32, %arg1: i32) -> (i32, i32, i32) {
    %c0_i32 = arith.constant 0 : i32
    %c0_i32_0 = arith.constant 0 : i32
    %c0_i32_1 = arith.constant 0 : i32
    return %arg0, %c0_i32, %c0_i32_0 : i32, i32, i32
  }
  func.func @transform_1(%arg0: i32, %arg1: i32) -> (i32, i32, i32) {
    %c0_i32 = arith.constant 0 : i32
    %c0_i32_0 = arith.constant 0 : i32
    %c0_i32_1 = arith.constant 0 : i32
    return %arg0, %c0_i32, %c0_i32_0 : i32, i32, i32
  }
  func.func @transform_2(%arg0: i32, %arg1: i32) -> (i32, i32, i32, i32) {
    %c0_i32 = arith.constant 0 : i32
    %c0_i32_0 = arith.constant 0 : i32
    %c0_i32_1 = arith.constant 0 : i32
    %c0_i32_2 = arith.constant 0 : i32
    return %arg1, %c0_i32, %c0_i32_0, %c0_i32_1 : i32, i32, i32, i32
  }
  func.func @transform_3(%arg0: i32, %arg1: i32) -> (i32, i32, i32, i32) {
    %c0_i32 = arith.constant 0 : i32
    %c0_i32_0 = arith.constant 0 : i32
    %c0_i32_1 = arith.constant 0 : i32
    %c0_i32_2 = arith.constant 0 : i32
    return %arg1, %c0_i32, %c0_i32_0, %c0_i32_1 : i32, i32, i32, i32
  }
  func.func @transform_4(%arg0: i32, %arg1: i32) -> (i32, i32, i32, i32) {
    %c0_i32 = arith.constant 0 : i32
    %c0_i32_0 = arith.constant 0 : i32
    %c0_i32_1 = arith.constant 0 : i32
    %c0_i32_2 = arith.constant 0 : i32
    return %arg1, %c0_i32, %c0_i32_0, %c0_i32_1 : i32, i32, i32, i32
  }
  func.func @transform_5(%arg0: i32, %arg1: i32) -> (i32, i32, i32, i32) {
    %c0_i32 = arith.constant 0 : i32
    %c0_i32_0 = arith.constant 0 : i32
    %c0_i32_1 = arith.constant 0 : i32
    %c0_i32_2 = arith.constant 0 : i32
    return %arg1, %c0_i32, %c0_i32_0, %c0_i32_1 : i32, i32, i32, i32
  }
  func.func @transform_6(%arg0: i32, %arg1: i32) -> (i32, i32, i32, i32) {
    %c0_i32 = arith.constant 0 : i32
    %c0_i32_0 = arith.constant 0 : i32
    %c0_i32_1 = arith.constant 0 : i32
    %c0_i32_2 = arith.constant 0 : i32
    return %arg1, %c0_i32, %c0_i32_0, %c0_i32_1 : i32, i32, i32, i32
  }
  func.func @transform_7(%arg0: i32, %arg1: i32) -> (i32, i32, i32, i32) {
    %c0_i32 = arith.constant 0 : i32
    %c0_i32_0 = arith.constant 0 : i32
    %c0_i32_1 = arith.constant 0 : i32
    %c0_i32_2 = arith.constant 0 : i32
    return %arg1, %c0_i32, %c0_i32_0, %c0_i32_1 : i32, i32, i32, i32
  }
  func.func @transform_8(%arg0: i32, %arg1: i32) -> (i32, i32, i32, i32) {
    %c0_i32 = arith.constant 0 : i32
    %c0_i32_0 = arith.constant 0 : i32
    %c0_i32_1 = arith.constant 0 : i32
    %c0_i32_2 = arith.constant 0 : i32
    return %arg1, %c0_i32, %c0_i32_0, %c0_i32_1 : i32, i32, i32, i32
  }
  func.func @transform_9(%arg0: i32, %arg1: i32) -> (i32, i32, i32) {
    %c0_i32 = arith.constant 0 : i32
    %c0_i32_0 = arith.constant 0 : i32
    %c0_i32_1 = arith.constant 0 : i32
    return %arg1, %c0_i32, %c0_i32_0 : i32, i32, i32
  }
  func.func @transform_10(%arg0: i32, %arg1: i32) -> (i32, i32, i32) {
    %c0_i32 = arith.constant 0 : i32
    %c0_i32_0 = arith.constant 0 : i32
    %c0_i32_1 = arith.constant 0 : i32
    return %arg1, %c0_i32, %c0_i32_0 : i32, i32, i32
  }
  func.func @transform_11(%arg0: i32, %arg1: i32) -> (i32, i32, i32) {
    %c0_i32 = arith.constant 0 : i32
    %c0_i32_0 = arith.constant 0 : i32
    %c0_i32_1 = arith.constant 0 : i32
    return %arg1, %c0_i32, %c0_i32_0 : i32, i32, i32
  }
  func.func @transform_12(%arg0: i32, %arg1: i32) -> (i32, i32, i32, i32) {
    %c0_i32 = arith.constant 0 : i32
    %c0_i32_0 = arith.constant 0 : i32
    %c0_i32_1 = arith.constant 0 : i32
    %c0_i32_2 = arith.constant 0 : i32
    return %arg1, %c0_i32, %c0_i32_0, %c0_i32_1 : i32, i32, i32, i32
  }
  func.func @transform_13(%arg0: i32, %arg1: i32) -> (i32, i32, i32) {
    %c0_i32 = arith.constant 0 : i32
    %c0_i32_0 = arith.constant 0 : i32
    %c0_i32_1 = arith.constant 0 : i32
    return %arg1, %c0_i32, %c0_i32_0 : i32, i32, i32
  }
  func.func @transform_14(%arg0: i32, %arg1: i32) -> (i32, i32, i32, i32) {
    %c0_i32 = arith.constant 0 : i32
    %c0_i32_0 = arith.constant 0 : i32
    %c0_i32_1 = arith.constant 0 : i32
    %c0_i32_2 = arith.constant 0 : i32
    return %arg1, %c0_i32, %c0_i32_0, %c0_i32_1 : i32, i32, i32, i32
  }
  func.func @transform_15(%arg0: i32, %arg1: i32) -> (i32, i32, i32) {
    %c0_i32 = arith.constant 0 : i32
    %c0_i32_0 = arith.constant 0 : i32
    %c0_i32_1 = arith.constant 0 : i32
    return %arg1, %c0_i32, %c0_i32_0 : i32, i32, i32
  }
  func.func @transform_16(%arg0: i32, %arg1: i32) -> (i32, i32, i32) {
    %c0_i32 = arith.constant 0 : i32
    %c0_i32_0 = arith.constant 0 : i32
    %c0_i32_1 = arith.constant 0 : i32
    return %arg1, %c0_i32, %c0_i32_0 : i32, i32, i32
  }
  func.func @transform_17(%arg0: i32, %arg1: i32) -> (i32, i32, i32) {
    %c0_i32 = arith.constant 0 : i32
    %c0_i32_0 = arith.constant 0 : i32
    %c0_i32_1 = arith.constant 0 : i32
    return %arg1, %c0_i32, %c0_i32_0 : i32, i32, i32
  }
  func.func @transform_18(%arg0: i32, %arg1: i32) -> (i32, i32, i32) {
    %c0_i32 = arith.constant 0 : i32
    %c0_i32_0 = arith.constant 0 : i32
    %c0_i32_1 = arith.constant 0 : i32
    return %arg0, %c0_i32, %c0_i32_0 : i32, i32, i32
  }
}

</mosaic_0001>

<bundles_post_ra>
// kernel: tpu_custom_call.1
= control target key start
LH: loop header
LB: loop body
LE: loop exit
PB: predicated region body
PF: predicated region fallthrough
CT: control target
= control target key end

     0   :  { %s3422_s0 = inlined_call_operand.vmem [shape: f32[2,16,32], index: 0, kind: input, shape index: {}]   ;;  %s3423_s1 = inlined_call_operand.vmem [shape: f32[2,16,1], index: 1, kind: input, shape index: {}]   ;;  %s3424_s2 = inlined_call_operand.vmem [shape: bf16[2,2,32,16], index: 2, kind: input, shape index: {}]   ;;  %s3425_s3 = inlined_call_operand.vmem [shape: f32[2,2,1,16], index: 3, kind: input, shape index: {}]   ;;  %s3426_s4 = inlined_call_operand.vmem [shape: bf16[2,2,32,16], index: 4, kind: input, shape index: {}]   ;;  %s3427_s5 = inlined_call_operand.vmem [shape: f32[2,2,1,16], index: 5, kind: input, shape index: {}]   ;;  %s3428_s6 = inlined_call_operand.vmem [shape: bf16[2,2,32,16], index: 6, kind: input, shape index: {}]   ;;  %s3429_s7 = inlined_call_operand.vmem [shape: f32[2,2,1,16], index: 7, kind: input, shape index: {}]   ;;  %s3430_s8 = inlined_call_operand.vmem [shape: bf16[2,2,16,32], index: 8, kind: input, shape index: {}]   ;;  %s3431_s9 = inlined_call_operand.vmem [shape: f32[2,1,32], index: 9, kind: input, shape index: {}]   ;;  %s3432_s10 = inlined_call_operand.vmem [shape: f32[2,1,32], index: 10, kind: input, shape index: {}]   ;;  %s3433_s11 = inlined_call_operand.vmem [shape: f32[2,1,32], index: 11, kind: input, shape index: {}]   ;;  %s3434_s12 = inlined_call_operand.hbm [shape: bf16[2,9,32,64], index: 12, kind: input, shape index: {}]   ;;  %s3435_s13 = inlined_call_operand.vmem [shape: f32[2,1,64], index: 13, kind: input, shape index: {}]   ;;  %s3436_s14 = inlined_call_operand.vmem [shape: bf16[2,1,64,32], index: 14, kind: input, shape index: {}]   ;;  %s3437_s15 = inlined_call_operand.vmem [shape: f32[2,1,32], index: 15, kind: input, shape index: {}]   ;;  %s3438_s16 = inlined_call_operand.vmem [shape: f32[2,1,32], index: 16, kind: input, shape index: {}]   ;;  %s3439_s17 = inlined_call_operand.vmem [shape: f32[2,1,32], index: 17, kind: input, shape index: {}]   ;;  %s3440_s18 = inlined_call_operand.hbm [shape: f32[2,16,32], index: 18, kind: output, shape index: {}]  }
   0x1   :  { %3462 = sst [smem:[#allocation27_spill]] %s3422_s0 }
   0x2   :  { %3463 = sst [smem:[#allocation28_spill]] %s3423_s1 }
   0x3   :  { %3464 = sst [smem:[#allocation29_spill]] %s3424_s2 }
   0x4   :  { %3465 = sst [smem:[#allocation30_spill]] %s3425_s3 }
   0x5   :  { %3466 = sst [smem:[#allocation31_spill]] %s3426_s4 }
   0x6   :  { %3467 = sst [smem:[#allocation32_spill]] %s3427_s5 }
   0x7   :  { %3468 = sst [smem:[#allocation33_spill]] %s3428_s6 }
   0x8   :  { %3469 = sst [smem:[#allocation34_spill]] %s3429_s7 }
   0x9   :  { %3470 = sst [smem:[#allocation35_spill]] %s3430_s8 }
   0xa   :  { %3471 = sst [smem:[#allocation36_spill]] %s3431_s9 }
   0xb   :  { %3472 = sst [smem:[#allocation37_spill]] %s3432_s10 }
   0xc   :  { %3473 = sst [smem:[#allocation38_spill]] %s3433_s11 }
   0xd   :  { %3474 = sst [smem:[#allocation39_spill]] %s3434_s12 }
   0xe   :  { %3475 = sst [smem:[#allocation40_spill]] %s3435_s13 }
   0xf   :  { %3476 = sst [smem:[#allocation41_spill]] %s3436_s14 }
  0x10   :  { %3477 = sst [smem:[#allocation42_spill]] %s3437_s15 }
  0x11   :  { %3478 = sst [smem:[#allocation43_spill]] %s3438_s16 }
  0x12   :  { %3479 = sst [smem:[#allocation44_spill]] %s3439_s17 }
  0x13   :  { %3480 = sst [smem:[#allocation45_spill]] %s3440_s18 }
  0x14   :  { %23 = vsyncpa [#allocation3], 0 }
  0x15   :  { %25 = vsyncpa [#allocation3 + $0x1], 0 }
  0x16   :  { %26 = vsyncpa [#allocation4], 0 }
  0x17   :  { %28 = vsyncpa [#allocation4 + $0x1], 0  ;;  %s2936_s27 = smov 0   ;;  %s2938_s28 = smov 0  }
  0x18   :  { %s2940_s29 = smov 0   ;;  %s2942_s30 = smov 0  }
  0x19   :  { %s2944_s0 = smov 0   ;;  %s2946_s19 = smov 0  }
  0x1a   :  { %s2948_s1 = smov 0   ;;  %s2950_s20 = smov 0  }
  0x1b   :  { %s2952_s21 = smov 0   ;;  %s2954_s22 = smov 0  }
  0x1c   :  { %s2956_s2 = smov 0  }
  0x1d LB: > { %3481 = sst [smem:[#allocation8_spill]] %s2793_s27  ;;  %s2240_s23 = sadd.s32 4294967295, %s2833_s2   ;;  %s2833_s2 = sphi %s2956_s2, %s34_s2   ;;  %s2829_s22 = sphi %s2954_s22, %s3554_s22   ;;  %s2825_s21 = sphi %s2952_s21, %s3553_s21   ;;  %s2821_s20 = sphi %s2950_s20, %s3552_s20   ;;  %s2817_s1 = sphi %s2948_s1, %s3551_s1   ;;  %s2813_s19 = sphi %s2946_s19, %s3550_s19   ;;  %s2809_s0 = sphi %s2944_s0, %s3549_s0   ;;  %s2805_s30 = sphi %s2942_s30, %s3548_s30   ;;  %s2801_s29 = sphi %s2940_s29, %s3547_s29   ;;  %s2797_s28 = sphi %s2938_s28, %s3546_s28   ;;  %s2793_s27 = sphi %s2936_s27, %s3545_s27  }
  0x1e   : > { %3482 = sst [smem:[#allocation9_spill]] %s2797_s28  ;;  %s2241_s24 = sadd.s32 4294967294, %s2833_s2  }
  0x1f   : > { %3483 = sst [smem:[#allocation10_spill]] %s2801_s29  ;;  %s43_s25 = sadd.s32 1, %s2825_s21 }
  0x20   : > { %3484 = sst [smem:[#allocation11_spill]] %s2809_s0  ;;  %s46_s26 = sadd.s32 1, %s2829_s22 }
  0x21   : > { %3485 = sst [smem:[#allocation12_spill]] %s2813_s19  ;;  %p44_p0 = scmp.ge.s32.totalorder %s43_s25, 2 }
  0x22   : > { %3486 = sst [smem:[#allocation13_spill]] %s2821_s20  ;;  %s365_s18 = sadd.s32 1, %s2813_s19 }
  0x23   : > { %3487 = sst [smem:[#allocation14_spill]] %s2825_s21  ;;  %p372_p1 = scmp.ne.s32.totalorder %s2813_s19, %s2809_s0 }
  0x24   : > { %3488 = sst [smem:[#allocation15_spill]] %s2829_s22  ;;  %p373_p2 = scmp.eq.s32.totalorder %s2833_s2, 0 }
  0x25   : > { %3489 = sst [smem:[#allocation16_spill]] %s2833_s2  ;;  %s3556_s25 = smov (%p44_p0, %s43_s25), 0 }
  0x26   : > { %3490 = sst [smem:[#allocation17_spill]] %s3556_s25  ;;  %s3558_s26 = smov (!%p44_p0, %s46_s26), %s2829_s22 }
  0x27   : > { %s362_s17 = ssub.s32 %s2825_s21, %s3556_s25  ;;  %p3002_p3 = por %p373_p2, %p372_p1 }
  0x28   : > { %p48_p4 = scmp.ge.s32.totalorder %s3558_s26, 2  ;;  %p363_p5 = scmp.eq.s32.totalorder %s362_s17, 0 }
  0x29   : > { %p378_p6 = scmp.ne.s32.totalorder %s2809_s0, %s2805_s30  ;;  %p379_p7 = scmp.eq.s32.totalorder %s2240_s23, 0 }
  0x2a   : > { %s3560_s26 = smov (%p48_p4, %s3558_s26), 0  ;;  %s521_s13 = sadd.s32 1, %s2801_s29 }
  0x2b   : > { %3492 = sst [smem:[#allocation18_spill]] %s3560_s26  ;;  %p3012_p8 = por %p379_p7, %p378_p6 }
  0x2c   : > { %s3010_s15 = scalar_select %p363_p5, %s2813_s19, %s365_s18  }
  0x2d   : > { %s518_s14 = ssub.s32 %s2829_s22, %s3560_s26  ;;  %p531_p10 = scmp.ne.s32.totalorder %s2801_s29, %s2797_s28 }
  0x2e   : > { %3493 = sst [smem:[#allocation19_spill]] %s3010_s15  ;;  %p519_p9 = scmp.eq.s32.totalorder %s518_s14, 0 }
  0x2f   : > { %p532_p11 = scmp.eq.s32.totalorder %s2240_s23, 3  ;;  %p537_p13 = scmp.ne.s32.totalorder %s2797_s28, %s2793_s27 }
  0x30   : > { %s3022_s17 = scalar_select %p519_p9, %s2801_s29, %s521_s13  }
  0x31   : > { %p3024_p12 = por %p532_p11, %p531_p10  ;;  %p538_p0 = scmp.eq.s32.totalorder %s2241_s24, 3 }
  0x32   : > { %3495 = sst [smem:[#allocation20_spill]] %s3022_s17  ;;  %p2544_p1 = scmp.lt.s32.totalorder %s2833_s2, 4 }
  0x33   : > { %s3496_s30 = scalar_select %p3024_p12, 1, 0 }
  0x34   : > { %s645_s18 = sand.u32 1, %s2813_s19   ;;  %p3032_p2 = por %p538_p0, %p537_p13 }
  0x35   : > { %3497 = sst [smem:[#allocation21_spill]] %s3496_s30  ;;  %s2529_s14 = smul.u32 144, %s645_s18 }
  0x36   : > { %s3498_s15 = scalar_select %p3032_p2, 1, 0 }
  0x37   : > { %p2537_p4 = pnand %p2544_p1, %p3002_p3  ;;  %s2530_s23 = smul.u32 144, %s2825_s21 }
  0x38   : > { %3499 = sst [smem:[#allocation22_spill]] %s3498_s15  ;;  %s649_s17 = scalar_lea.vmem [#allocation2], %s2529_s14 }
  0x39   : > { %s3500_s12 = sld [smem:[#allocation39_spill]]  ;;  %s657_s29 = sshll.u32 %s649_s17, 4  ;;  %s658_s29 = int_to_ptr.vmem [resolvable:$true] %s657_s29 }
  0x3a   : > { %s646_s24 = scalar_lea.sflag [#allocation3], %s645_s18  ;;  %s2835_s19 = smov 64  }
  0x3b   : > { %s2836_s30 = smov 4   ;;  %p2245_p5 = scmp.ge.s32.totalorder %s2833_s2, 1 }
  0x3c   : > { %p697_p6 = scmp.lt.s32.totalorder %s2833_s2, 5 }
  0x3e   : > { %p698_p7 = pnand %p2245_p5, %p697_p6 }
  0x3f   : > { %s654_s22 = scalar_lea.hbm %s3500_s12, %s2530_s23 }
  0x40   : > { %s655_s27 = sshll.u32 %s654_s22, 4  ;;  %701 = sbr.rel (%p698_p7) target bundleno = 2348 (0x92c), region = 92  ;;  %s656_s27 = int_to_ptr.hbm [resolvable:$true] %s655_s27 }
  0x41   : > { %2539 = dma.hbm_to_vmem [thread:$0]  (!%p2537_p4), %s656_s27, 2304, %s658_s29, %s646_s24, %s2835_s19, %s2835_s19, %s2836_s30  }
  0x45   : > { %s703_s16 = sand.u32 1, %s2809_s0  }
  0x46   : > { %s2531_s21 = smul.u32 144, %s703_s16  ;;  %s704_s15 = scalar_lea.sflag [#allocation3], %s703_s16 }
  0x48   : > { %s3045_s26 = scalar_lea.vmem [#allocation2], %s2531_s21 }
  0x49   : > { %3501 = sst [smem:[#allocation23_spill]] %s3045_s26 }
  0x4a   : > { %2784 = dma.done.wait (%p3012_p8), %s704_s15, 2304  }
  0x4b   : > { %2786 = vsyncadd (%p3012_p8), %s704_s15, 4294964992  ;;  %s3452_s27 = sand.u32 1, %s2797_s28   ;;  %p829_p3 = scmp.lt.s32.totalorder %s2821_s20, 1 }
  0x4c   : > { %s2246_s29 = sshll.u32 %s3452_s27, 4  ;;  %p839_p9 = scmp.lt.s32.totalorder %s2817_s1, 1 }
  0x4d   : > { %s830_s19 = scalar_select %p829_p3, %s2821_s20, 1 }
  0x4e   : > { %s3058_s22 = scalar_select %p839_p9, %s2817_s1, 1 }
  0x4f   : > { %s2485_s15 = sshll.u32 %s830_s19, 4  ;;  %s3502_s17 = sld [smem:[#allocation27_spill]] }
  0x50   : > { %s3503_s23 = sld [smem:[#allocation28_spill]]  ;;  %s2487_s24 = sshll.u32 %s3058_s22, 5 }
  0x51   : > { %s2253_s16 = sshll.u32 %s3058_s22, 1  ;;  %s3505_s0 = sld [smem:[#allocation29_spill]] }
  0x52   : > { %s3506_s3 = sld [smem:[#allocation30_spill]]  ;;  %s2490_s19 = sshll.u32 %s3058_s22, 4 }
  0x53   : > { %s3507_s4 = sld [smem:[#allocation31_spill]]  ;;  %s3139_s11 = scalar_lea.vmem [#allocation5], %s2246_s29 }
  0x54   : > { %s3508_s5 = sld [smem:[#allocation32_spill]]  ;;  %p2264_p8 = scmp.ne.s32.totalorder %s2817_s1, 0 }
  0x55   : > { %s833_s30 = scalar_lea.vmem %s3502_s17, %s2485_s15  ;;  %s3509_s6 = sld [smem:[#allocation33_spill]] }
  0x56   : > { %s3066_s13 = scalar_lea.vmem %s3503_s23, %s2485_s15  ;;  %s3511_s7 = sld [smem:[#allocation34_spill]] }
  0x57   : > { %3504 = sst [smem:[#allocation24_spill]] %s3066_s13  ;;  %s3073_s2 = scalar_lea.vmem %s3505_s0, %s2487_s24 }
  0x58   : > { %s3078_s21 = scalar_lea.vmem %s3506_s3, %s2253_s16  ;;  %s3514_s8 = sld [smem:[#allocation35_spill]] }
  0x59   : > { %s3083_s15 = scalar_lea.vmem %s3507_s4, %s2487_s24  ;;  %s3518_s25 = sld [smem:[#allocation41_spill]] }
  0x5a   : > { %s3088_s23 = scalar_lea.vmem %s3508_s5, %s2253_s16  ;;  %s3520_s14 = sld [smem:[#allocation43_spill]] }
  0x5b   : > { %s3093_s0 = scalar_lea.vmem %s3509_s6, %s2487_s24  ;;  %s3521_s12 = sld [smem:[#allocation44_spill]] }
  0x5c   : > { %3510 = sst [smem:[#allocation25_spill]] %s3093_s0  ;;  %s3098_s28 = scalar_lea.vmem %s3511_s7, %s2253_s16 }
  0x5d   : > { %3512 = sst [smem:[#allocation26_spill]] %s3098_s28 }
  0x5e   : > { %s3108_s18 = scalar_lea.vmem %s3514_s8, %s2490_s19  ;;  %s3517_s7 = sld [smem:[#allocation40_spill]] }
  0x5f   : > { %s3125_s17 = scalar_lea.vmem %s3518_s25, %s2487_s24  ;;  %s3519_s19 = sld [smem:[#allocation42_spill]] }
  0x60   : > { %s893_s20 = scalar_lea.vmem %s3520_s14, %s3058_s22 }
  0x61   : > { %s896_s26 = scalar_lea.vmem %s3521_s12, %s3058_s22  ;;  %901 = sbr.rel (%p2264_p8) target bundleno = 105 (0x69), region = 100 }
  0x64   : > { %s882_s28 = scalar_lea.vmem %s3517_s7, %s3058_s22 }
  0x65   : > { %s890_s8 = scalar_lea.vmem %s3519_s19, %s3058_s22 }
  0x66   : > { %v902_v0 = vld [vmem:[%s833_s30] sm:$0xff]  ;;  %vm904_vm0 = vcmask 261120   ;;  %v903_v1 = vld [vmem:[%s833_s30 + $0x8] sm:$0xff] }
  0x67   : > { %905 = vst.msk [vmem:[%s3139_s11] sm:$0xff] %vm904_vm0, %v902_v0 }
  0x68   : > { %906 = vst.msk [vmem:[%s3139_s11 + $0x8] sm:$0xff] %vm904_vm0, %v903_v1 }
  0x69 PF: > { %v2493_v2 = vld [vmem:[%s3073_s2 + $0x8] sm:$0xff]  ;;  %v2492_v4 = vld [vmem:[%s3073_s2] sm:$0xff]  ;;  %vm937_vm1 = vcmask 261120   ;;  %s3522_s7 = sld [smem:[#allocation25_spill]]  ;;  %vm1025_vm2 = vcmask 130048   ;;  %v2502_v30 = vld [vmem:[%s3083_s15 + $0x18] sm:$0xff] }
  0x6a   : > { %v2495_v3 = vld [vmem:[%s3083_s15 + $0x8] sm:$0xff]  ;;  %v2494_v5 = vld [vmem:[%s3083_s15] sm:$0xff]  ;;  %947 = vmatpush.bf16.msra.mxu0 %v2493_v2  ;;  %s3523_s9 = sld [smem:[#allocation26_spill]]  ;;  %v2501_v31 = vld [vmem:[%s3083_s15 + $0x10] sm:$0xff] }
  0x6b   : > { %981 = vmatpush.bf16.msra.mxu1 %v2495_v3  ;;  %v2643_v11 = vld [vmem:[%s3088_s23] ss:$0 sm:$0xff]  ;;  %v2500_v48 = vld [vmem:[%s3073_s2 + $0x18] sm:$0xff]  ;;  %v2499_v49 = vld [vmem:[%s3073_s2 + $0x10] sm:$0xff]  ;;  %s3524_s2 = sld [smem:[#allocation36_spill]] }
  0x6c   : > { %v2642_v15 = vld [vmem:[%s3078_s21] ss:$0 sm:$0xff]  ;;  %v2645_v59 = vld [vmem:[%s3088_s23 + $0x1] ss:$0 sm:$0xff]  ;;  %s3526_s30 = sld [smem:[#allocation24_spill]] }
  0x6d   : > { %v2498_v50 = vld [vmem:[%s3108_s18] sm:$0xff]  ;;  %s3527_s24 = sld [smem:[#allocation23_spill]] }
  0x6e   : > { %v3149_v6 = vld [vmem:[%s3139_s11] sm:$0xff]  ;;  %948 = vmatpush.bf16.msra.mxu0 %v2492_v4  ;;  %s3528_s23 = sld [smem:[#allocation37_spill]] }
  0x6f   : > { %v3152_v7 = vld [vmem:[%s3139_s11 + $0x8] sm:$0xff]  ;;  %982 = vmatpush.bf16.msra.mxu1 %v2494_v5  ;;  %v2496_v23 = vld [vmem:[%s3522_s7] sm:$0xff]  ;;  %s3530_s27 = sld [smem:[#allocation38_spill]] }
  0x70   : > { %v3156_v8 = vpack.c.bf16 %v3152_v7, %v3149_v6  ;;  %v2497_v22 = vld [vmem:[%s3522_s7 + $0x8] sm:$0xff]  ;;  %v2644_v36 = vld [vmem:[%s3523_s9] ss:$0 sm:$0xff]  ;;  %v2646_v5 = vld [vmem:[%s3078_s21 + $0x1] ss:$0 sm:$0xff] }
  0x71   : > { %1015 = vmatpush.bf16.msra.mxu2 %v2497_v22  ;;  %s3525_s29 = scalar_lea.vmem %s3524_s2, %s3058_s22 }
  0x72   : > { %2273 = vmatmul.msk.bf16.vlgmr.msra.gmra.mxu0 %vm937_vm1, %v3156_v8  ;;  %2282 = vmatmul.msk.bf16.vlgmr.msra.gmra.mxu1 %vm937_vm1, %v3156_v8 }
  0x73   : > { %1108 = vmatpush.bf16.msrb.mxu1 %v2498_v50 }
  0x74   : > { %s3529_s0 = scalar_lea.vmem %s3528_s23, %s3058_s22 }
  0x75   : > { %1016 = vmatpush.bf16.msra.mxu2 %v2496_v23  ;;  %s3531_s3 = scalar_lea.vmem %s3530_s27, %s3058_s22  ;;  %s3538_s22 = sld [smem:[#allocation45_spill]] }
  0x78   : > { %2291 = vmatmul.msk.bf16.vlgmr.msra.gmra.mxu2 %vm937_vm1, %v3156_v8 }
  0x79   : > { %1145 = vmatpush.bf16.msrb.mxu2 %v2500_v48 }
  0x7d   : > { %1146 = vmatpush.bf16.msrb.mxu2 %v2499_v49  ;;  %v2647_v49 = vld [vmem:[%s3525_s29] ss:$0 sm:$0xff] }
  0x88   : > { %2312 = vmatmul.msk.bf16.vlgmr.msrb.gmra.mxu2 %vm937_vm1, %v3156_v8 }
  0xef   : > { %v984_v9 = vpop.f32.mrf.mxu1  ;;  %v950_v10 = vpop.f32.mrf.mxu0 }
  0xf0   : > { %v985_v13 = vadd.f32 %v2643_v11, %v984_v9  ;;  %v951_v19 = vadd.f32 %v2642_v15, %v950_v10 }
  0xf7   : > { %v986_v12 = vpop.f32.mrf.mxu1  ;;  %v952_v17 = vpop.f32.mrf.mxu0 }
  0xf8   : > { %v987_v14 = vadd.f32 %v2643_v11, %v986_v12  ;;  %v953_v20 = vadd.f32 %v2642_v15, %v952_v17 }
  0xfa   : > { %v1024_v16 = vpack.c.bf16 %v987_v14, %v985_v13  ;;  %v1023_v21 = vpack.c.bf16 %v953_v20, %v951_v19  ;;  %v2504_v13 = vld [vmem:[%s3522_s7 + $0x18] sm:$0xff]  ;;  %v2503_v14 = vld [vmem:[%s3522_s7 + $0x10] sm:$0xff] }
  0xfb   : > { %v1018_v34 = vpop.f32.mrf.mxu2 }
  0xfc   : > { %v1030_v18 = vsel %vm1025_vm2, %v1024_v16, 0  ;;  %v1019_v38 = vadd.f32 %v2644_v36, %v1018_v34 }
  0xfd   : > { %1039 = vmatpush.bf16.xpose.msra.mxu3 %v1030_v18 }
 0x103   : > { %v1020_v40 = vpop.f32.mrf.mxu2 }
 0x104   : > { %2292 = vmatmul.msk.bf16.vlgmr.msra.gmra.mxu3 %vm1025_vm2, %v1023_v21  ;;  %v1021_v41 = vadd.f32 %v2644_v36, %v1020_v40 }
 0x105   : > { %1181 = vmatpush.bf16.msrb.mxu3 %v2502_v30 }
 0x106   : > { %v1071_v45 = vpack.c.bf16 %v1021_v41, %v1019_v38  ;;  %v2505_v38 = vld [vmem:[%s3108_s18 + $0x8] sm:$0xff] }
 0x108   : > { %1082 = vmatpush.bf16.msrb.mxu0 %v1071_v45 }
 0x109   : > { %1182 = vmatpush.bf16.msrb.mxu3 %v2501_v31 }
 0x10b   : > { %v1148_v2 = vpop.f32.mrf.mxu2 }
 0x10c   : > { %v1149_v10 = vadd.f32 %v2646_v5, %v1148_v2  ;;  %1217 = vmatpush.bf16.msra.mxu0 %v2504_v13 }
 0x10d   : > { %1310 = vmatpush.bf16.msra.mxu3 %v2505_v38 }
 0x110   : > { %1218 = vmatpush.bf16.msra.mxu0 %v2503_v14 }
 0x113   : > { %v1150_v9 = vpop.f32.mrf.mxu2 }
 0x114   : > { %2326 = vmatmul.msk.bf16.vlgmr.msrb.gmra.mxu3 %vm937_vm1, %v3156_v8  ;;  %v1151_v11 = vadd.f32 %v2646_v5, %v1150_v9 }
 0x116   : > { %v1225_v12 = vpack.c.bf16 %v1151_v11, %v1149_v10 }
 0x187   : > { %v1041_v24 = vpop.f32.mrf.mxu3 }
 0x188   : > { %v1046_v25 = vmul.f32 0.25, %v1041_v24  ;;  %v2648_v24 = vld [vmem:[%s3523_s9 + $0x1] ss:$0 sm:$0xff] }
 0x18a   : > { %v1048_v26 = vsel %vm1025_vm2, %v1046_v25, -inf }
 0x18b   : > { %1049 = vmax.xlane.f32.xlu0 %v1048_v26 }
 0x18f   : > { %v1043_v27 = vpop.f32.mrf.mxu3 }
 0x190   : > { %v1047_v28 = vmul.f32 0.25, %v1043_v27 }
 0x192   : > { %v1051_v29 = vsel %vm1025_vm2, %v1047_v28, -inf }
 0x193   : > { %1052 = vmax.xlane.f32.xlu0 %v1051_v29 }
 0x197   : > { %v1184_v58 = vpop.f32.mrf.mxu3 }
 0x198   : > { %v1185_v61 = vadd.f32 %v2645_v59, %v1184_v58 }
 0x19f   : > { %v1186_v60 = vpop.f32.mrf.mxu3 }
 0x1a0   : > { %v1187_v62 = vadd.f32 %v2645_v59, %v1186_v60  ;;  %v2837_v60 = vmov 32.0  }
 0x1a2   : > { %v1226_v63 = vpack.c.bf16 %v1187_v62, %v1185_v61 }
 0x1a4   : > { %v1231_v0 = vsel %vm1025_vm2, %v1226_v63, 0  ;;  %v909_v63 = vld [vmem:[%s3526_s30] sm:$0xff] }
 0x1a5   : > { %1240 = vmatpush.bf16.xpose.msra.mxu1 %v1231_v0  ;;  %v2838_v0 = vmov 0  }
 0x1a6   : > { %2640 = vset.pattern.permute.xlu0 %v2838_v0  ;;  %2641 = vset.pattern.permute.xlu1 %v2838_v0 }
 0x1fe   : > { %v1050_v32 = vpop.xlane.xlu0 %1049 }
 0x1ff   : > { %v1054_v33 = vsub.f32 %v1046_v25, %v1050_v32 }
 0x201   : > { %v1056_v35 = vmul.f32 1.442695, %v1054_v33 }
 0x203   : > { %2655 = vpow2.f32 %v1056_v35 }
 0x206   : > { %v1053_v37 = vpop.xlane.xlu0 %1052 }
 0x207   : > { %v1055_v39 = vsub.f32 %v1047_v28, %v1053_v37 }
 0x209   : > { %v2656_v42 = vpop.eup %2655  ;;  %v1058_v43 = vmul.f32 1.442695, %v1055_v39 }
 0x20a   : > { %v1060_v44 = vsel %vm1025_vm2, %v2656_v42, 0.0 }
 0x20b   : > { %2657 = vpow2.f32 %v1058_v43  ;;  %1061 = vadd.xlane.f32.xlu1 %v1060_v44 }
 0x211   : > { %v2658_v46 = vpop.eup %2657 }
 0x212   : > { %v1063_v47 = vsel %vm1025_vm2, %v2658_v46, 0.0 }
 0x213   : > { %1064 = vadd.xlane.f32.xlu1 %v1063_v47 }
 0x27e   : > { %v1062_v51 = vpop.xlane.xlu1 %1061 }
 0x27f   : > { %2659 = vrcp.f32 %v1062_v51 }
 0x285   : > { %v2660_v53 = vpop.eup %2659 }
 0x286   : > { %v1065_v52 = vpop.xlane.xlu1 %1064  ;;  %v1068_v55 = vmul.f32 %v2660_v53, %v2656_v42 }
 0x287   : > { %2661 = vrcp.f32 %v1065_v52 }
 0x28d   : > { %v2662_v54 = vpop.eup %2661 }
 0x28e   : > { %v1069_v56 = vmul.f32 %v2662_v54, %v2658_v46 }
 0x290   : > { %v1070_v57 = vpack.c.bf16 %v1069_v56, %v1068_v55 }
 0x292   : > { %2293 = vmatmul.msk.bf16.vlgmr.msrb.gmra.mxu0 %vm1025_vm2, %v1070_v57 }
 0x2a2   : > { %2340 = vmatmul.msk.bf16.vlgmr.msra.gmra.mxu0 %vm937_vm1, %v3156_v8 }
 0x30f   : > { %v1084_v1 = vpop.f32.mrf.mxu0 }
 0x317   : > { %v1086_v3 = vpop.f32.mrf.mxu0 }
 0x318   : > { %v1089_v4 = vpack.c.bf16 %v1086_v3, %v1084_v1 }
 0x31a   : > { %2298 = vmatmul.msk.bf16.vlgmr.msrb.gmra.mxu1 %vm1025_vm2, %v1089_v4 }
 0x31f   : > { %v1220_v23 = vpop.f32.mrf.mxu0 }
 0x320   : > { %v1221_v27 = vadd.f32 %v2648_v24, %v1220_v23  ;;  %v2509_v23 = vld [vmem:[%s3527_s24 + $0x18] sm:$0xff] }
 0x321   : > { %1493 = vmatpush.bf16.msrb.mxu1 %v2509_v23 }
 0x327   : > { %v1222_v29 = vpop.f32.mrf.mxu0 }
 0x328   : > { %v1223_v8 = vadd.f32 %v2648_v24, %v1222_v29  ;;  %v2506_v24 = vld [vmem:[%s3527_s24] sm:$0xff] }
 0x32a   : > { %2341 = vmatmul.msk.bf16.vlgmr.msra.gmra.mxu1 %vm1025_vm2, %v1225_v12  ;;  %v1272_v30 = vpack.c.bf16 %v1223_v8, %v1221_v27  ;;  %v2512_v27 = vld [vmem:[%s3527_s24 + $0x30] sm:$0xff] }
 0x32c   : > { %1283 = vmatpush.bf16.msra.mxu2 %v1272_v30 }
 0x397   : > { %v1110_v15 = vpop.f32.mrf.mxu1 }
 0x398   : > { %v1115_v50 = vadd.f32 %v2647_v49, %v1110_v15 }
 0x39f   : > { %v1112_v16 = vpop.f32.mrf.mxu1 }
 0x3a0   : > { %v1116_v55 = vadd.f32 %v2647_v49, %v1112_v16  ;;  %v910_v16 = vld [vmem:[%s3526_s30 + $0x8] sm:$0xff]  ;;  %s1970_s30 = sshll.u32 %s3139_s11, 4  ;;  %s1971_s30 = int_to_ptr.vmem [resolvable:$true] %s1970_s30 }
 0x3a7   : > { %v1242_v17 = vpop.f32.mrf.mxu1 }
 0x3a8   : > { %v1247_v18 = vmul.f32 0.25, %v1242_v17  ;;  %v2507_v17 = vld [vmem:[%s3527_s24 + $0x8] sm:$0xff] }
 0x3a9   : > { %1443 = vmatpush.bf16.msrb.mxu0 %v2507_v17 }
 0x3aa   : > { %v1249_v19 = vsel %vm1025_vm2, %v1247_v18, -inf }
 0x3ab   : > { %1250 = vmax.xlane.f32.xlu2 %v1249_v19 }
 0x3ad   : > { %1444 = vmatpush.bf16.msrb.mxu0 %v2506_v24 }
 0x3af   : > { %v1244_v20 = vpop.f32.mrf.mxu1 }
 0x3b0   : > { %v1248_v21 = vmul.f32 0.25, %v1244_v20 }
 0x3b2   : > { %v1252_v22 = vsel %vm1025_vm2, %v1248_v21, -inf }
 0x3b3   : > { %1253 = vmax.xlane.f32.xlu2 %v1252_v22  ;;  %v2513_v22 = vld [vmem:[%s3527_s24 + $0x38] sm:$0xff] }
 0x3b4   : > { %1593 = vmatpush.bf16.msrb.mxu3 %v2513_v22 }
 0x3b8   : > { %1594 = vmatpush.bf16.msrb.mxu3 %v2512_v27 }
 0x41e   : > { %v1251_v25 = vpop.xlane.xlu2 %1250 }
 0x41f   : > { %v1255_v26 = vsub.f32 %v1247_v18, %v1251_v25  ;;  %v2511_v18 = vld [vmem:[%s3527_s24 + $0x28] sm:$0xff]  ;;  %v2510_v25 = vld [vmem:[%s3527_s24 + $0x20] sm:$0xff] }
 0x420   : > { %1543 = vmatpush.bf16.msrb.mxu2 %v2511_v18 }
 0x421   : > { %v1257_v28 = vmul.f32 1.442695, %v1255_v26  ;;  %v2508_v26 = vld [vmem:[%s3527_s24 + $0x10] sm:$0xff] }
 0x422   : > { %1494 = vmatpush.bf16.msrb.mxu1 %v2508_v26 }
 0x423   : > { %2663 = vpow2.f32 %v1257_v28 }
 0x424   : > { %1544 = vmatpush.bf16.msrb.mxu2 %v2510_v25 }
 0x426   : > { %v1254_v31 = vpop.xlane.xlu2 %1253 }
 0x427   : > { %v1256_v32 = vsub.f32 %v1248_v21, %v1254_v31 }
 0x429   : > { %v2664_v33 = vpop.eup %2663  ;;  %v1259_v34 = vmul.f32 1.442695, %v1256_v32 }
 0x42a   : > { %v1261_v35 = vsel %vm1025_vm2, %v2664_v33, 0.0 }
 0x42b   : > { %2665 = vpow2.f32 %v1259_v34  ;;  %1262 = vadd.xlane.f32.xlu0 %v1261_v35  ;;  %v2515_v34 = vld [vmem:[%s3527_s24 + $0x48] sm:$0xff] }
 0x42c   : > { %v2519_v35 = vld [vmem:[%s3527_s24 + $0x68] sm:$0xff]  ;;  %1630 = vmatpush.bf16.msra.mxu0 %v2515_v34 }
 0x431   : > { %v2666_v36 = vpop.eup %2665 }
 0x432   : > { %v1264_v37 = vsel %vm1025_vm2, %v2666_v36, 0.0 }
 0x433   : > { %1265 = vadd.xlane.f32.xlu1 %v1264_v37  ;;  %v2517_v37 = vld [vmem:[%s3527_s24 + $0x58] sm:$0xff] }
 0x434   : > { %1680 = vmatpush.bf16.msra.mxu1 %v2517_v37 }
 0x49e   : > { %v1263_v39 = vpop.xlane.xlu0 %1262 }
 0x49f   : > { %2667 = vrcp.f32 %v1263_v39  ;;  %v2514_v39 = vld [vmem:[%s3527_s24 + $0x40] sm:$0xff] }
 0x4a0   : > { %1631 = vmatpush.bf16.msra.mxu0 %v2514_v39 }
 0x4a5   : > { %v2668_v41 = vpop.eup %2667 }
 0x4a6   : > { %v1266_v40 = vpop.xlane.xlu1 %1265  ;;  %v1269_v43 = vmul.f32 %v2668_v41, %v2664_v33 }
 0x4a7   : > { %2669 = vrcp.f32 %v1266_v40  ;;  %v2518_v40 = vld [vmem:[%s3527_s24 + $0x60] sm:$0xff] }
 0x4a8   : > { %2671 = vrcp.f32 %v2837_v60 }
 0x4ad   : > { %v2670_v42 = vpop.eup %2669 }
 0x4ae   : > { %v1270_v44 = vmul.f32 %v2670_v42, %v2666_v36  ;;  %v2672_v61 = vpop.eup %2671  ;;  %v2521_v36 = vld [vmem:[%s3527_s24 + $0x78] sm:$0xff]  ;;  %v2516_v42 = vld [vmem:[%s3527_s24 + $0x50] sm:$0xff] }
 0x4af   : > { %v1330_v62 = vmul.f32 32.0, %v2672_v61  ;;  %vm1334_vm3 = vweird.f32 %v2672_v61  ;;  %1681 = vmatpush.bf16.msra.mxu1 %v2516_v42 }
 0x4b0   : > { %v1271_v45 = vpack.c.bf16 %v1270_v44, %v1269_v43  ;;  %v2520_v43 = vld [vmem:[%s3527_s24 + $0x70] sm:$0xff] }
 0x4b2   : > { %2342 = vmatmul.msk.bf16.vlgmr.msra.gmra.mxu2 %vm1025_vm2, %v1271_v45 }
 0x4b3   : > { %1730 = vmatpush.bf16.msra.mxu2 %v2519_v35 }
 0x4b7   : > { %1731 = vmatpush.bf16.msra.mxu2 %v2518_v40 }
 0x535   : > { %v1285_v46 = vpop.f32.mrf.mxu2 }
 0x53d   : > { %v1287_v47 = vpop.f32.mrf.mxu2 }
 0x53e   : > { %v1290_v48 = vpack.c.bf16 %v1287_v47, %v1285_v46 }
 0x540   : > { %2349 = vmatmul.msk.bf16.vlgmr.msra.gmra.mxu3 %vm1025_vm2, %v1290_v48  ;;  %v2649_v48 = vld [vmem:[%s3529_s0] ss:$0 sm:$0xff] }
 0x541   : > { %1780 = vmatpush.bf16.msra.mxu3 %v2521_v36 }
 0x545   : > { %1781 = vmatpush.bf16.msra.mxu3 %v2520_v43 }
 0x5c3   : > { %v1312_v51 = vpop.f32.mrf.mxu3 }
 0x5c4   : > { %v1317_v52 = vadd.f32 %v1312_v51, %v1115_v50 }
 0x5c6   : > { %v1319_v53 = vadd.f32 %v1317_v52, %v3149_v6  ;;  %v1331_v6 = vsub.f32 1.0, %v1330_v62 }
 0x5c8   : > { %v1323_v54 = vsel %vm937_vm1, %v1319_v53, 0.0  ;;  %v1332_v1 = vmul.f32 %v2672_v61, %v1331_v6 }
 0x5c9   : > { %1324 = vadd.xlane.f32.xlu2 %v1323_v54 }
 0x5ca   : > { %v1333_v2 = vadd.f32 %v2672_v61, %v1332_v1 }
 0x5cb   : > { %v1314_v56 = vpop.f32.mrf.mxu3 }
 0x5cc   : > { %v1318_v57 = vadd.f32 %v1314_v56, %v1116_v55  ;;  %v3212_v3 = vsel %vm1334_vm3, %v2672_v61, %v1333_v2  ;;  %v1403_v55 = vlaneseq }
 0x5ce   : > { %v1320_v58 = vadd.f32 %v1318_v57, %v3152_v7  ;;  %v3259_v60 = vshrl.u32 %v1403_v55, 7 }
 0x5d0   : > { %v1326_v59 = vsel %vm937_vm1, %v1320_v58, 0.0  ;;  %vm1405_vm10 = vcmp.lt.s32.totalorder %v3259_v60, 4  ;;  %vm1409_vm11 = vcmp.ge.s32.totalorder %v3259_v60, 4  ;;  %vm1455_vm12 = vcmp.lt.s32.totalorder %v3259_v60, 3 }
 0x5d1   : > { %1327 = vadd.xlane.f32.xlu0 %v1326_v59  ;;  %vm1505_vm13 = vcmp.lt.s32.totalorder %v3259_v60, 2  ;;  %vm1458_vm14 = vcmp.ge.s32.totalorder %v3259_v60, 3  ;;  %vm1555_vm15 = vcmp.lt.s32.totalorder %v3259_v60, 1  ;;  %vm1508_vm0 = vcmp.ge.s32.totalorder %v3259_v60, 2 }
 0x5d2   : > { %vm1558_vm2 = vcmp.ge.s32.totalorder %v3259_v60, 1  ;;  %vm1642_vm3 = vcmp.lt.s32.totalorder %v3259_v60, 7 }
 0x5e5   : > { %1386 = vperm.xlu0 %2640, %v909_v63  }
 0x63c   : > { %v1325_v7 = vpop.xlane.xlu2 %1324 }
 0x63d   : > { %v1336_v4 = vmul.f32 %v3212_v3, %v1325_v7 }
 0x63f   : > { %v3215_v5 = vsub.f32 %v1319_v53, %v1336_v4  ;;  %v2650_v53 = vld [vmem:[%s3531_s3] ss:$0 sm:$0xff] }
 0x641   : > { %v1340_v9 = vmul.f32 %v3215_v5, %v3215_v5 }
 0x643   : > { %v1342_v10 = vsel %vm937_vm1, %v1340_v9, 0.0 }
 0x644   : > { %1343 = vadd.xlane.f32.xlu1 %v1342_v10  ;;  %v1328_v11 = vpop.xlane.xlu0 %1327 }
 0x645   : > { %v1337_v12 = vmul.f32 %v3212_v3, %v1328_v11 }
 0x647   : > { %v3221_v13 = vsub.f32 %v1320_v58, %v1337_v12 }
 0x649   : > { %v1341_v14 = vmul.f32 %v3221_v13, %v3221_v13 }
 0x64b   : > { %v1345_v15 = vsel %vm937_vm1, %v1341_v14, 0.0 }
 0x64c   : > { %1346 = vadd.xlane.f32.xlu2 %v1345_v15 }
 0x657   : > { %v3256_v58 = vpop.permute.xlu0 %1386 }
 0x65d   : > { %1391 = vperm.xlu1 %2641, %v910_v16  }
 0x6b7   : > { %v1344_v19 = vpop.xlane.xlu1 %1343 }
 0x6b8   : > { %v1348_v20 = vmul.f32 %v1344_v19, %v3212_v3 }
 0x6ba   : > { %v1350_v21 = vadd.f32 1e-05, %v1348_v20  ;;  %v2523_v20 = vld [vmem:[%s3527_s24 + $0x88] sm:$0xff] }
 0x6bc   : > { %2673 = vrsqrt.f32 %v1350_v21  ;;  %vm1358_vm5 = vweird.f32 %v1350_v21 }
 0x6bf   : > { %v1347_v28 = vpop.xlane.xlu2 %1346 }
 0x6c0   : > { %v1349_v29 = vmul.f32 %v1347_v28, %v3212_v3 }
 0x6c2   : > { %v2674_v8 = vpop.eup %2673  ;;  %v1351_v30 = vadd.f32 1e-05, %v1349_v29  ;;  %v2522_v29 = vld [vmem:[%s3527_s24 + $0x80] sm:$0xff]  ;;  %s3539_s24 = smov %s3538_s22 }
 0x6c3   : > { %v1353_v31 = vmul.f32 %v2674_v8, %v1350_v21  ;;  %vm1359_vm4 = vweird.f32 %v2674_v8  ;;  %s2731_s3 = scalar_lea.hbm %s3539_s24, 32 }
 0x6c4   : > { %2675 = vrsqrt.f32 %v1351_v30  ;;  %vm1360_vm6 = vmor %vm1358_vm5, %vm1359_vm4  ;;  %vm1368_vm8 = vweird.f32 %v1351_v30  ;;  %vm1692_vm4 = vcmp.lt.s32.totalorder %v3259_v60, 6 }
 0x6c5   : > { %v1354_v32 = vmul.f32 %v2674_v8, %v1353_v31 }
 0x6c7   : > { %v1355_v33 = vmul.f32 0.5, %v1354_v32 }
 0x6c9   : > { %v1356_v38 = vsub.f32 1.5, %v1355_v33 }
 0x6ca   : > { %v2676_v41 = vpop.eup %2675 }
 0x6cb   : > { %v1357_v44 = vmul.f32 %v2674_v8, %v1356_v38  ;;  %v1363_v45 = vmul.f32 %v2676_v41, %v1351_v30  ;;  %vm1369_vm7 = vweird.f32 %v2676_v41 }
 0x6cc   : > { %vm1370_vm9 = vmor %vm1368_vm8, %vm1369_vm7 }
 0x6cd   : > { %v1364_v46 = vmul.f32 %v2676_v41, %v1363_v45  ;;  %v1361_v47 = vsel %vm1360_vm6, %v2674_v8, %v1357_v44  ;;  %v1408_v8 = vadd.s32 8, %v3259_v60  ;;  %vm1742_vm6 = vcmp.lt.s32.totalorder %v3259_v60, 5  ;;  %v2651_v60 = vld [vmem:[%s882_s28] ss:$0 sm:$0xff] }
 0x6ce   : > { %v1372_v49 = vmul.f32 %v1361_v47, %v3215_v5 }
 0x6cf   : > { %v1365_v50 = vmul.f32 0.5, %v1364_v46  ;;  %v3264_v63 = vpop.permute.xlu1 %1391  ;;  %vm1646_vm5 = vcmp.lt.s32.totalorder %v1408_v8, 15  ;;  %vm1696_vm7 = vcmp.lt.s32.totalorder %v1408_v8, 14  ;;  %vm1746_vm8 = vcmp.lt.s32.totalorder %v1408_v8, 13 }
 0x6d0   : > { %v1377_v52 = vmul.f32 %v2649_v48, %v1372_v49 }
 0x6d1   : > { %v1366_v51 = vsub.f32 1.5, %v1365_v50 }
 0x6d2   : > { %v1382_v56 = vadd.f32 %v2650_v53, %v1377_v52 }
 0x6d3   : > { %v1367_v54 = vmul.f32 %v2676_v41, %v1366_v51 }
 0x6d4   : > { %v3262_v62 = vmul.f32 %v3256_v58, %v1382_v56 }
 0x6d5   : > { %v1371_v57 = vsel %vm1370_vm9, %v2676_v41, %v1367_v54  ;;  %vm1791_vm9 = vcmp.lt.s32.totalorder %v1408_v8, 12  ;;  %v2526_v54 = vld [vmem:[%s3125_s17 + $0x10] sm:$0xff] }
 0x6d6   : > { %v1373_v59 = vmul.f32 %v1371_v57, %v3221_v13  ;;  %v1401_v1 = vrot.slane %v3262_v62, 4  ;;  %v1453_v2 = vrot.slane %v3262_v62, 5  ;;  %v1503_v10 = vrot.slane %v3262_v62, 6  ;;  %v2525_v57 = vld [vmem:[%s3125_s17 + $0x8] sm:$0xff] }
 0x6d7   : > { %v1553_v11 = vrot.slane %v3262_v62, 7  ;;  %v1640_v32 = vrot.slane %v3262_v62, 1  ;;  %v1690_v33 = vrot.slane %v3262_v62, 2  ;;  %v1740_v37 = vrot.slane %v3262_v62, 3 }
 0x6d8   : > { %v1378_v61 = vmul.f32 %v2649_v48, %v1373_v59 }
 0x6da   : > { %v1383_v0 = vadd.f32 %v2650_v53, %v1378_v61  ;;  %v2527_v53 = vld [vmem:[%s3125_s17 + $0x18] sm:$0xff] }
 0x6dc   : > { %v3268_v6 = vmul.f32 %v3264_v63, %v1383_v0  ;;  %v2524_v0 = vld [vmem:[%s3125_s17] sm:$0xff] }
 0x6de   : > { %v1402_v7 = vrot.slane %v3268_v6, 4  ;;  %v1454_v4 = vrot.slane %v3268_v6, 5  ;;  %v1504_v5 = vrot.slane %v3268_v6, 6  ;;  %v1554_v9 = vrot.slane %v3268_v6, 7 }
 0x6df   : > { %v1641_v30 = vrot.slane %v3268_v6, 1  ;;  %v1691_v31 = vrot.slane %v3268_v6, 2  ;;  %v1741_v34 = vrot.slane %v3268_v6, 3  ;;  %v1603_v43 = vpack.c.bf16 %v3268_v6, %v3262_v62 }
 0x6e0   : > { %v1406_v12 = vsel %vm1405_vm10, %v1401_v1, %v1402_v7  ;;  %v1407_v13 = vsel %vm1405_vm10, %v1402_v7, %v1401_v1  ;;  %v1456_v14 = vsel %vm1455_vm12, %v1453_v2, %v1454_v4  ;;  %v1457_v15 = vsel %vm1455_vm12, %v1454_v4, %v1453_v2 }
 0x6e1   : > { %v1415_v16 = vsel %vm1409_vm11, %v1407_v13, 0.0  ;;  %v1464_v17 = vsel %vm1458_vm14, %v1457_v15, 0.0  ;;  %v1506_v18 = vsel %vm1505_vm13, %v1503_v10, %v1504_v5  ;;  %v1507_v19 = vsel %vm1505_vm13, %v1504_v5, %v1503_v10 }
 0x6e2   : > { %v1417_v21 = vpack.c.bf16 %v1406_v12, %v1415_v16  ;;  %v1466_v22 = vpack.c.bf16 %v1456_v14, %v1464_v17  ;;  %v1514_v23 = vsel %vm1508_vm0, %v1507_v19, 0.0  ;;  %v1556_v24 = vsel %vm1555_vm15, %v1553_v11, %v1554_v9 }
 0x6e3   : > { %v1516_v25 = vpack.c.bf16 %v1506_v18, %v1514_v23  ;;  %v1557_v26 = vsel %vm1555_vm15, %v1554_v9, %v1553_v11  ;;  %v1644_v35 = vsel %vm1642_vm3, %v1641_v30, %v1640_v32  ;;  %v1694_v36 = vsel %vm1692_vm4, %v1691_v31, %v1690_v33 }
 0x6e4   : > { %2358 = vmatmul.msk.bf16.vlgmr.msrb.gmra.mxu0 %vm937_vm1, %v1417_v21  ;;  %2371 = vmatmul.msk.bf16.vlgmr.msrb.gmra.mxu1 %vm937_vm1, %v1466_v22  ;;  %v1564_v27 = vsel %vm1558_vm2, %v1557_v26, 0.0  ;;  %v1643_v38 = vsel %vm1642_vm3, %v1640_v32, %v1641_v30  ;;  %v1652_v39 = vsel %vm1646_vm5, %v1644_v35, 0.0  ;;  %v1744_v40 = vsel %vm1742_vm6, %v1741_v34, %v1740_v37 }
 0x6e5   : > { %2384 = vmatmul.msk.bf16.vlgmr.msrb.gmra.mxu2 %vm937_vm1, %v1516_v25  ;;  %v1566_v28 = vpack.c.bf16 %v1556_v24, %v1564_v27  ;;  %1825 = vmatpush.bf16.msrb.mxu0 %v2523_v20  ;;  %v1693_v41 = vsel %vm1692_vm4, %v1690_v33, %v1691_v31  ;;  %v1702_v42 = vsel %vm1696_vm7, %v1694_v36, 0.0  ;;  %v1653_v44 = vpack.c.bf16 %v1652_v39, %v1643_v38  ;;  %v2652_v36 = vld [vmem:[%s890_s8] ss:$0 sm:$0xff]  ;;  %s3534_s8 = sld [smem:[#allocation13_spill]] }
 0x6e6   : > { %v1743_v45 = vsel %vm1742_vm6, %v1740_v37, %v1741_v34  ;;  %v1752_v46 = vsel %vm1746_vm8, %v1744_v40, 0.0  ;;  %v1703_v47 = vpack.c.bf16 %v1702_v42, %v1693_v41  ;;  %v1797_v49 = vsel %vm1791_vm9, %v1407_v13, 0.0  ;;  %1883 = vmatpush.bf16.msrb.mxu1 %v2527_v53 }
 0x6e7   : > { %2397 = vmatmul.msk.bf16.vlgmr.msrb.gmra.mxu3 %vm937_vm1, %v1566_v28  ;;  %v1753_v48 = vpack.c.bf16 %v1752_v46, %v1743_v45  ;;  %v1798_v50 = vpack.c.bf16 %v1797_v49, %v1406_v12  ;;  %vm1875_vm10 = vcmask 523264  }
 0x6e9   : > { %1826 = vmatpush.bf16.msrb.mxu0 %v2522_v29 }
 0x6ea   : > { %1884 = vmatpush.bf16.msrb.mxu1 %v2526_v54 }
 0x6eb   : > { %s2528_s10 = sshll.u32 %s3534_s8, 4 }
 0x6ee   : > { %1885 = vmatpush.bf16.msrb.mxu1 %v2525_v57 }
 0x6f2   : > { %1886 = vmatpush.bf16.msrb.mxu1 %v2524_v0 }
 0x6f4   : > { %2410 = vmatmul.msk.bf16.vlgmr.msra.gmra.mxu0 %vm937_vm1, %v1603_v43  ;;  %2423 = vmatmul.msk.bf16.vlgmr.msra.gmra.mxu1 %vm937_vm1, %v1653_v44 }
 0x6f5   : > { %2436 = vmatmul.msk.bf16.vlgmr.msra.gmra.mxu2 %vm937_vm1, %v1703_v47 }
 0x6f7   : > { %2449 = vmatmul.msk.bf16.vlgmr.msra.gmra.mxu3 %vm937_vm1, %v1753_v48 }
 0x704   : > { %2462 = vmatmul.msk.bf16.vlgmr.msrb.gmra.mxu0 %vm937_vm1, %v1798_v50 }
 0x761   : > { %v1446_v51 = vpop.f32.mrf.mxu0  ;;  %v1496_v52 = vpop.f32.mrf.mxu1 }
 0x762   : > { %v1451_v1 = vadd.f32 %v2651_v60, %v1446_v51 }
 0x764   : > { %v1501_v9 = vadd.f32 %v1496_v52, %v1451_v1 }
 0x768   : > { %v1546_v55 = vpop.f32.mrf.mxu2 }
 0x769   : > { %v1448_v56 = vpop.f32.mrf.mxu0  ;;  %v1498_v61 = vpop.f32.mrf.mxu1  ;;  %v1551_v10 = vadd.f32 %v1546_v55, %v1501_v9  ;;  %v2653_v9 = vld [vmem:[%s893_s20] ss:$0 sm:$0xff]  ;;  %s3537_s20 = sld [smem:[#allocation9_spill]] }
 0x76a   : > { %v1596_v59 = vpop.f32.mrf.mxu3  ;;  %v1452_v4 = vadd.f32 %v2651_v60, %v1448_v56 }
 0x76b   : > { %v1601_v16 = vadd.f32 %v1596_v59, %v1551_v10 }
 0x76c   : > { %v1502_v11 = vadd.f32 %v1498_v61, %v1452_v4 }
 0x76f   : > { %s3541_s15 = sand.u32 1, %s3537_s20  }
 0x770   : > { %v1548_v2 = vpop.f32.mrf.mxu2  ;;  %s1958_s23 = scalar_lea.sflag [#allocation4], %s3541_s15 }
 0x771   : > { %v1633_v7 = vpop.f32.mrf.mxu0  ;;  %v1683_v12 = vpop.f32.mrf.mxu1  ;;  %v1552_v13 = vadd.f32 %v1548_v2, %v1502_v11  ;;  %v2654_v11 = vld [vmem:[%s896_s26] ss:$0 sm:$0xff]  ;;  %s1969_s26 = scalar_lea.hbm %s3538_s22, %s2528_s10 }
 0x772   : > { %v1598_v5 = vpop.f32.mrf.mxu3  ;;  %v1638_v18 = vadd.f32 %v1633_v7, %v1601_v16  ;;  %s1972_s21 = sshll.u32 %s1969_s26, 4  ;;  %s1973_s21 = int_to_ptr.hbm [resolvable:$true] %s1972_s21 }
 0x773   : > { %v1602_v17 = vadd.f32 %v1598_v5, %v1552_v13  ;;  %s2725_s0 = sshra.s32 %s1973_s21, 4  ;;  %s2726_s0 = int_to_ptr.hbm [resolvable:$true] %s2725_s0 }
 0x774   : > { %v1688_v21 = vadd.f32 %v1683_v12, %v1638_v18  ;;  %s2727_s18 = scalar_lea.hbm %s2726_s0, 16  ;;  %p2732_p0 = scmp.lt.s32.totalorder %s2726_s0, %s3539_s24 }
 0x775   : > { %p2728_p10 = scmp.ne.s32.totalorder %s2726_s0, %s2727_s18  ;;  %p2733_p1 = scmp.lt.s32.totalorder %s2731_s3, %s2727_s18 }
 0x777   : > { %p2729_p11 = pnand %p2728_p10, %p3024_p12  ;;  %p2734_p4 = por %p2733_p1, %p2732_p0 }
 0x778   : > { %v1733_v14 = vpop.f32.mrf.mxu2 }
 0x779   : > { %v1635_v15 = vpop.f32.mrf.mxu0  ;;  %v1685_v22 = vpop.f32.mrf.mxu1  ;;  %v1738_v25 = vadd.f32 %v1733_v14, %v1688_v21  ;;  %p2730_p13 = pneg %p2729_p11 }
 0x77a   : > { %v1783_v19 = vpop.f32.mrf.mxu3  ;;  %v1639_v20 = vadd.f32 %v1635_v15, %v1602_v17 }
 0x77b   : > { %v1788_v28 = vadd.f32 %v1783_v19, %v1738_v25  ;;  %p2735_p5 = pnand %p2734_p4, %p2730_p13 }
 0x77c   : > { %v1689_v26 = vadd.f32 %v1685_v22, %v1639_v20 }
 0x780   : > { %v1735_v23 = vpop.f32.mrf.mxu2 }
 0x781   : > { %v1828_v24 = vpop.f32.mrf.mxu0  ;;  %v1739_v27 = vadd.f32 %v1735_v23, %v1689_v26 }
 0x782   : > { %v1785_v29 = vpop.f32.mrf.mxu3  ;;  %v1833_v30 = vadd.f32 %v1828_v24, %v1788_v28 }
 0x783   : > { %v1789_v8 = vadd.f32 %v1785_v29, %v1739_v27 }
 0x784   : > { %v1835_v33 = vmax.f32 %v1833_v30, 0.0 }
 0x789   : > { %v1830_v31 = vpop.f32.mrf.mxu0 }
 0x78a   : > { %v1834_v32 = vadd.f32 %v1830_v31, %v1789_v8 }
 0x78c   : > { %v1836_v34 = vmax.f32 %v1834_v32, 0.0 }
 0x78e   : > { %v1842_v35 = vpack.c.bf16 %v1836_v34, %v1835_v33 }
 0x790   : > { %2479 = vmatmul.msk.bf16.vlgmr.msrb.gmra.mxu1 %vm1875_vm10, %v1842_v35 }
 0x80d   : > { %v1888_v37 = vpop.f32.mrf.mxu1 }
 0x80e   : > { %v1893_v38 = vadd.f32 %v2652_v36, %v1888_v37 }
 0x810   : > { %v1895_v39 = vadd.f32 %v1893_v38, %v3262_v62 }
 0x812   : > { %v1899_v40 = vsel %vm937_vm1, %v1895_v39, 0.0 }
 0x813   : > { %1900 = vadd.xlane.f32.xlu2 %v1899_v40 }
 0x815   : > { %v1890_v41 = vpop.f32.mrf.mxu1 }
 0x816   : > { %v1894_v42 = vadd.f32 %v2652_v36, %v1890_v41 }
 0x818   : > { %v1896_v43 = vadd.f32 %v1894_v42, %v3268_v6 }
 0x81a   : > { %v1902_v44 = vsel %vm937_vm1, %v1896_v43, 0.0 }
 0x81b   : > { %1903 = vadd.xlane.f32.xlu2 %v1902_v44 }
 0x886   : > { %v1901_v45 = vpop.xlane.xlu2 %1900 }
 0x887   : > { %v1905_v46 = vmul.f32 %v1901_v45, %v3212_v3 }
 0x889   : > { %v1907_v47 = vsub.f32 %v1895_v39, %v1905_v46 }
 0x88b   : > { %v1909_v48 = vmul.f32 %v1907_v47, %v1907_v47 }
 0x88d   : > { %v1911_v49 = vsel %vm937_vm1, %v1909_v48, 0.0 }
 0x88e   : > { %1912 = vadd.xlane.f32.xlu2 %v1911_v49  ;;  %v1904_v50 = vpop.xlane.xlu2 %1903 }
 0x88f   : > { %v1906_v62 = vmul.f32 %v1904_v50, %v3212_v3 }
 0x891   : > { %v1908_v51 = vsub.f32 %v1896_v43, %v1906_v62 }
 0x893   : > { %v1910_v52 = vmul.f32 %v1908_v51, %v1908_v51 }
 0x895   : > { %v1914_v53 = vsel %vm937_vm1, %v1910_v52, 0.0 }
 0x896   : > { %1915 = vadd.xlane.f32.xlu2 %v1914_v53 }
 0x901   : > { %v1913_v6 = vpop.xlane.xlu2 %1912 }
 0x902   : > { %v1917_v54 = vmul.f32 %v1913_v6, %v3212_v3 }
 0x904   : > { %v1919_v55 = vadd.f32 1e-05, %v1917_v54 }
 0x906   : > { %2677 = vrsqrt.f32 %v1919_v55  ;;  %vm1927_vm12 = vweird.f32 %v1919_v55 }
 0x909   : > { %v1916_v56 = vpop.xlane.xlu2 %1915 }
 0x90a   : > { %v1918_v57 = vmul.f32 %v1916_v56, %v3212_v3 }
 0x90c   : > { %v2678_v59 = vpop.eup %2677  ;;  %v1920_v60 = vadd.f32 1e-05, %v1918_v57 }
 0x90d   : > { %v1922_v61 = vmul.f32 %v2678_v59, %v1919_v55  ;;  %vm1928_vm11 = vweird.f32 %v2678_v59 }
 0x90e   : > { %2679 = vrsqrt.f32 %v1920_v60  ;;  %vm1929_vm13 = vmor %vm1927_vm12, %vm1928_vm11  ;;  %vm1937_vm15 = vweird.f32 %v1920_v60 }
 0x90f   : > { %v1923_v0 = vmul.f32 %v2678_v59, %v1922_v61 }
 0x911   : > { %v1924_v1 = vmul.f32 0.5, %v1923_v0 }
 0x913   : > { %v1925_v2 = vsub.f32 1.5, %v1924_v1 }
 0x914   : > { %v2680_v7 = vpop.eup %2679 }
 0x915   : > { %v1926_v4 = vmul.f32 %v2678_v59, %v1925_v2  ;;  %v1932_v5 = vmul.f32 %v2680_v7, %v1920_v60  ;;  %vm1938_vm14 = vweird.f32 %v2680_v7 }
 0x916   : > { %vm1939_vm0 = vmor %vm1937_vm15, %vm1938_vm14 }
 0x917   : > { %v1930_v3 = vsel %vm1929_vm13, %v2678_v59, %v1926_v4  ;;  %v1933_v10 = vmul.f32 %v2680_v7, %v1932_v5 }
 0x918   : > { %v1941_v12 = vmul.f32 %v1930_v3, %v1907_v47 }
 0x919   : > { %v1934_v13 = vmul.f32 0.5, %v1933_v10 }
 0x91a   : > { %v1946_v14 = vmul.f32 %v2653_v9, %v1941_v12 }
 0x91b   : > { %v1935_v15 = vsub.f32 1.5, %v1934_v13 }
 0x91c   : > { %v1951_v16 = vadd.f32 %v2654_v11, %v1946_v14 }
 0x91d   : > { %v1936_v17 = vmul.f32 %v2680_v7, %v1935_v15 }
 0x91e   : > { %v1953_v18 = vmul.f32 %v1951_v16, %v3256_v58 }
 0x91f   : > { %v1940_v19 = vsel %vm1939_vm0, %v2680_v7, %v1936_v17 }
 0x920   : > { %1955 = vst.msk [vmem:[%s3139_s11] sm:$0xff] %vm937_vm1, %v1953_v18  ;;  %v1942_v20 = vmul.f32 %v1940_v19, %v1908_v51 }
 0x922   : > { %v1947_v21 = vmul.f32 %v2653_v9, %v1942_v20 }
 0x924   : > { %v1952_v22 = vadd.f32 %v2654_v11, %v1947_v21 }
 0x926   : > { %v1954_v23 = vmul.f32 %v1952_v22, %v3264_v63 }
 0x928   : > { %1956 = vst.msk [vmem:[%s3139_s11 + $0x8] sm:$0xff] %vm937_vm1, %v1954_v23 }
 0x929   : > { %2738 = shalt.err (!%p2735_p5)
}
 0x92a   : > { %s2839_s11 = smov 128   ;;  %s2840_s13 = smov 8  }
 0x92b   : > { %2534 = dma.vmem_to_hbm [thread:$0]  (%p3024_p12), %s1971_s30, 256, %s1973_s21, %s1958_s23, %s2839_s11, %s2839_s11, %s2840_s13  }
 0x92c PF: > { %s3542_s28 = sld [smem:[#allocation16_spill]] }
 0x92d   : > { %s3543_s17 = sld [smem:[#allocation8_spill]] }
 0x932   : > { %p2545_p6 = scmp.ge.s32.totalorder %s3542_s28, 2 }
 0x933   : > { %s1987_s8 = sand.u32 1, %s3543_s17  }
 0x934   : > { %p2541_p7 = pnand %p2545_p6, %p3032_p2  ;;  %s1988_s5 = scalar_lea.sflag [#allocation4], %s1987_s8 }
 0x936   : > { %p2542_p3 = pneg %p2541_p7 }
 0x938   : > { %2788 = dma.done.wait (%p2542_p3), %s1988_s5, 256  }
 0x939   : > { %2790 = vsyncadd (%p2542_p3), %s1988_s5, 4294967040  ;;  %s34_s2 = sadd.s32 1, %s3542_s28   ;;  %s3545_s27 = sld [smem:[#allocation9_spill]] }
 0x93a   : > { %p31_p9 = scmp.ge.s32.totalorder %s34_s2, 6   ;;  %s3546_s28 = sld [smem:[#allocation10_spill]] }
 0x93b   : > { %s3547_s29 = sld [smem:[#allocation20_spill]] }
 0x93c   : > { %s3548_s30 = sld [smem:[#allocation11_spill]] }
 0x93d   : > { %s3549_s0 = sld [smem:[#allocation12_spill]] }
 0x93e   : > { %s3550_s19 = sld [smem:[#allocation19_spill]]  ;;  %33 = sbr.rel (!%p31_p9) target bundleno = 29 (0x1d), region = 207 }
 0x93f   : > { %s3551_s1 = sld [smem:[#allocation14_spill]] }
 0x940   : > { %s3552_s20 = sld [smem:[#allocation15_spill]] }
 0x941   : > { %s3553_s21 = sld [smem:[#allocation17_spill]] }
 0x942   : > { %s3554_s22 = sld [smem:[#allocation18_spill]] }
 0x943   :  { %1994 = vsyncpa [#allocation3], 1 }
 0x944   :  { %1996 = vsyncpa [#allocation3 + $0x1], 1 }
 0x945   :  { %1997 = vsyncpa [#allocation4], 1 }
 0x946   :  { %1999 = vsyncpa [#allocation4 + $0x1], 1 }

</bundles_post_ra>
